<compile_context>
chip_gen: v6e
topology: v6e:2x2x1
jax: 0.10.0
libtpu: 0.0.40
codegen_flags: <defaults>
</compile_context>

<pallas_src>
import functools

import jax
import jax.numpy as jnp
import numpy as np
from jax import lax
from jax.experimental import pallas as pl
from jax.experimental.pallas import tpu as pltpu


def _sigmoid(z):
    # sigmoid(z) = 0.5 * tanh(z/2) + 0.5 -> one EUP transcendental + mul/add,
    # no f32 divide on the VALU in the gate epilogue.
    return 0.5 * jnp.tanh(0.5 * z) + 0.5


def _ego_lstm_kernel(x_ref, w_ih_ref, w_hh_ref, b_ref, w1_ref, b1_ref,
                     w2_ref, b2_ref, csum_ref, lastsel_ref, out_ref, xw_ref,
                     *, hidden_size, seq_len):
    H, T = hidden_size, seq_len
    TB = x_ref.shape[1]                          # x tile is time-major (T, TB, I)

    w_ih = w_ih_ref[...]                         # (I, 4H) bf16
    w_hh = w_hh_ref[...]                         # (H, 4H) bf16
    b = b_ref[...]                               # (1, 4H) f32 == b_ih + b_hh

    # ---------------- hoisted input projection --------------------------------
    # All K=I matmuls are issued before the recurrence (off the serial chain)
    # and parked (with bias folded in) in a VMEM scratch slab.
    for t in range(T):                           # static, fully unrolled
        xw_ref[t] = (jnp.dot(x_ref[t].astype(jnp.bfloat16), w_ih,
                             preferred_element_type=jnp.float32) + b)

    # ---------------- LSTM recurrence (PyTorch gate order i, f, g, o) ---------
    # f32 state / accumulation; bf16 only on the MXU operands.
    def lstm_step(t, carry):
        h, c = carry
        gates = xw_ref[t] + jnp.dot(h.astype(jnp.bfloat16), w_hh,
                                    preferred_element_type=jnp.float32)
        i_g = _sigmoid(gates[:, 0 * H:1 * H])
        f_g = _sigmoid(gates[:, 1 * H:2 * H])
        g_g = jnp.tanh(gates[:, 2 * H:3 * H])
        o_g = _sigmoid(gates[:, 3 * H:4 * H])
        c_new = f_g * c + i_g * g_g
        h_new = o_g * jnp.tanh(c_new)
        return h_new, c_new

    h0 = jnp.zeros((TB, H), jnp.float32)
    c0 = jnp.zeros((TB, H), jnp.float32)
    h_final, _ = lax.fori_loop(0, T, lstm_step, (h0, c0), unroll=True)

    # ---------------- MLP head: Linear(H,H) + ReLU + Linear(H, OUT_W) ---------
    w1 = w1_ref[...]                             # (H, H)      bf16
    w2 = w2_ref[...]                             # (H, OUT_W)  bf16, coord-major, zero-padded
    hid = jnp.maximum(
        jnp.dot(h_final.astype(jnp.bfloat16), w1,
                preferred_element_type=jnp.float32) + b1_ref[...], 0.0)
    delta = (jnp.dot(hid.astype(jnp.bfloat16), w2,
                     preferred_element_type=jnp.float32) + b2_ref[...])  # (TB, OUT_W)

    # ---------------- cumsum over future axis + last-pos residual -------------
    # Two matmuls against precomputed constant matrices. Kept in f32 on
    # purpose: they run once per tile and the cumsum amplifies quantization
    # error by up to F terms.
    x_last = x_ref[T - 1].astype(jnp.float32)    # (TB, I)
    out = (jnp.dot(delta, csum_ref[...], preferred_element_type=jnp.float32)
           + jnp.dot(x_last, lastsel_ref[...], preferred_element_type=jnp.float32))
    out_ref[...] = out.astype(out_ref.dtype)


def _pick_batch_tile(B, block_b):
    if B <= 8:
        return B
    # Aim for >= 4 batch tiles (so the "parallel" grid axis can shard across
    # both v7x TensorCores) with sublane-aligned (multiple-of-8) tile rows.
    target = ((-(-B // 4)) + 7) // 8 * 8
    return max(8, min(block_b, target))


def residual_ego_lstm_forward(x, params, *, future_len, block_b=128):
    """x: (B, T, input_size) -> (B, future_len, 2). params use PyTorch layouts."""
    B, T, I = x.shape
    w_ih, w_hh = params["w_ih"], params["w_hh"]      # (4H, I), (4H, H)
    b_ih, b_hh = params["b_ih"], params["b_hh"]      # (4H,), (4H,)
    w1, b1 = params["w1"], params["b1"]              # (H, H), (H,)
    w2, b2 = params["w2"], params["b2"]              # (2F, H), (2F,), (future, coord) order
    H = w_hh.shape[1]
    F = future_len
    OUT_W = max(128, ((2 * F + 127) // 128) * 128)   # lane-dense padded head width

    # --- wrapper-side layout plumbing (no in-kernel compute) ------------------
    w_ih_t = jnp.asarray(w_ih).T.astype(jnp.bfloat16)      # (I, 4H)
    w_hh_t = jnp.asarray(w_hh).T.astype(jnp.bfloat16)      # (H, 4H)
    b_comb = (jnp.asarray(b_ih) + jnp.asarray(b_hh)).reshape(1, 4 * H)
    w1_t = jnp.asarray(w1).T.astype(jnp.bfloat16)          # (H, H)
    b1_r = jnp.asarray(b1).reshape(1, H)
    # fc output rows: PyTorch (future, coord)-interleaved -> coord-major, then
    # zero-pad to OUT_W so the output slab and cumsum matmul are lane-dense.
    w2_cm = jnp.asarray(w2).reshape(F, 2, H).transpose(1, 0, 2).reshape(2 * F, H)
    w2_t = jnp.pad(w2_cm.T, ((0, 0), (0, OUT_W - 2 * F))).astype(jnp.bfloat16)
    b2_cm = jnp.pad(jnp.asarray(b2).reshape(F, 2).T.reshape(1, 2 * F),
                    ((0, 0), (0, OUT_W - 2 * F)))          # (1, OUT_W) f32

    # Precomputed (OUT_W, OUT_W) block-upper-triangular cumsum matrix
    # (coord-major) and the (I, OUT_W) last-observed-position selector.
    tri = np.triu(np.ones((F, F), np.float32))
    csum_np = np.zeros((OUT_W, OUT_W), np.float32)
    csum_np[:F, :F] = tri
    csum_np[F:2 * F, F:2 * F] = tri
    csum = jnp.asarray(csum_np)
    lastsel_np = np.zeros((I, OUT_W), np.float32)
    lastsel_np[0, :F] = 1.0                                 # x coord -> cols [0, F)
    lastsel_np[1, F:2 * F] = 1.0                            # y coord -> cols [F, 2F)
    lastsel = jnp.asarray(lastsel_np)

    # time-major x so each recurrent step is a cheap leading-axis ref index
    x_tm = jnp.transpose(x, (1, 0, 2))               # (T, B, I)

    tb = _pick_batch_tile(B, block_b)
    b_pad = pl.cdiv(B, tb) * tb
    if b_pad != B:
        x_tm = jnp.pad(x_tm, ((0, 0), (0, b_pad - B), (0, 0)))
    grid = (b_pad // tb,)

    kernel = functools.partial(_ego_lstm_kernel, hidden_size=H, seq_len=T)

    flops = int(b_pad * T * (2 * I * 4 * H + 2 * H * 4 * H)
                + b_pad * (2 * H * H + 2 * H * OUT_W
                           + 2 * OUT_W * OUT_W + 2 * I * OUT_W))
    bytes_accessed = int(4 * (b_pad * T * I + b_pad * OUT_W + OUT_W * OUT_W
                              + I * OUT_W + 4 * H + H + OUT_W)
                         + 2 * (4 * H * (I + H) + H * H + H * OUT_W))

    out_flat = pl.pallas_call(
        kernel,
        out_shape=jax.ShapeDtypeStruct((b_pad, OUT_W), jnp.float32),
        grid_spec=pltpu.PrefetchScalarGridSpec(
            num_scalar_prefetch=0,
            grid=grid,
            in_specs=[
                pl.BlockSpec((T, tb, I), lambda i: (0, i, 0)),   # streamed batch tile
                pl.BlockSpec((I, 4 * H), lambda i: (0, 0)),      # weights: constant maps,
                pl.BlockSpec((H, 4 * H), lambda i: (0, 0)),      # VMEM-resident across grid
                pl.BlockSpec((1, 4 * H), lambda i: (0, 0)),
                pl.BlockSpec((H, H), lambda i: (0, 0)),
                pl.BlockSpec((1, H), lambda i: (0, 0)),
                pl.BlockSpec((H, OUT_W), lambda i: (0, 0)),
                pl.BlockSpec((1, OUT_W), lambda i: (0, 0)),
                pl.BlockSpec((OUT_W, OUT_W), lambda i: (0, 0)),  # cumsum matrix
                pl.BlockSpec((I, OUT_W), lambda i: (0, 0)),      # last-pos selector
            ],
            out_specs=pl.BlockSpec((tb, OUT_W), lambda i: (i, 0)),
            scratch_shapes=[pltpu.VMEM((T, tb, 4 * H), jnp.float32)],  # hoisted x@W_ih
        ),
        compiler_params=pltpu.CompilerParams(
            dimension_semantics=("parallel",),       # batch tiles across TCs (v7x)
            vmem_limit_bytes=32 * 1024 * 1024,       # safe on v5e/v6e/v7x
        ),
        cost_estimate=pl.CostEstimate(
            flops=flops, transcendentals=int(b_pad * T * 5 * H),
            bytes_accessed=bytes_accessed),
    )(x_tm, w_ih_t, w_hh_t, b_comb, w1_t, b1_r, w2_t, b2_cm, csum, lastsel)

    # (B, OUT_W) coord-major slab -> PyTorch (B, F, 2)
    return out_flat[:B, :2 * F].reshape(B, 2, F).transpose(0, 2, 1)


if __name__ == "__main__":
    # module defaults: input_size=6, hidden_size=128, future_len=60, output_size=2
    B, T, I = 4, 8, 6
    H, F = 128, 60

    key = jax.random.PRNGKey(0)
    ks = jax.random.split(key, 9)
    s = 0.1
    x = jax.random.normal(ks[0], (B, T, I), jnp.float32)
    params = {
        "w_ih": jax.random.normal(ks[1], (4 * H, I), jnp.float32) * s,
        "w_hh": jax.random.normal(ks[2], (4 * H, H), jnp.float32) * s,
        "b_ih": jax.random.normal(ks[3], (4 * H,), jnp.float32) * s,
        "b_hh": jax.random.normal(ks[4], (4 * H,), jnp.float32) * s,
        "w1": jax.random.normal(ks[5], (H, H), jnp.float32) * s,
        "b1": jax.random.normal(ks[6], (H,), jnp.float32) * s,
        "w2": jax.random.normal(ks[7], (2 * F, H), jnp.float32) * s,
        "b2": jax.random.normal(ks[8], (2 * F,), jnp.float32) * s,
    }

    out = residual_ego_lstm_forward(x, params, future_len=F)
    jax.block_until_ready(out)

    # pure-JAX f32 reference mirroring the PyTorch forward exactly
    def ref_forward(xr):
        h = jnp.zeros((B, H), jnp.float32)
        c = jnp.zeros((B, H), jnp.float32)
        for t in range(T):
            gates = (xr[:, t, :] @ params["w_ih"].T + params["b_ih"]
                     + h @ params["w_hh"].T + params["b_hh"])
            i_g = jax.nn.sigmoid(gates[:, 0 * H:1 * H])
            f_g = jax.nn.sigmoid(gates[:, 1 * H:2 * H])
            g_g = jnp.tanh(gates[:, 2 * H:3 * H])
            o_g = jax.nn.sigmoid(gates[:, 3 * H:4 * H])
            c = f_g * c + i_g * g_g
            h = o_g * jnp.tanh(c)
        hid = jnp.maximum(h @ params["w1"].T + params["b1"], 0.0)
        delta = (hid @ params["w2"].T + params["b2"]).reshape(B, F, 2)
        last_pos = xr[:, -1, :2]
        return last_pos[:, None, :] + jnp.cumsum(delta, axis=1)

    ref = ref_forward(x)
    assert out.shape == (B, F, 2)
    max_err = float(jnp.max(jnp.abs(out - ref)))
    # bf16 MXU operands (f32 accumulate, f32 state) vs an all-f32 reference;
    # cumsum over 60 steps amplifies the quantization noise -> 5e-2 tolerance.
    assert jnp.allclose(out, ref, atol=5e-2, rtol=5e-2), f"max abs err {max_err}"
    print("KERNEL_OK")
</pallas_src>

<mosaic_0001>
module attributes {stable_mosaic.version = 11 : i64} {
  func.func @_ego_lstm_kernel(%arg0: i32, %arg1: memref<8x4x6xf32, #tpu.memory_space<vmem>>, %arg2: memref<6x512xbf16, #tpu.memory_space<vmem>>, %arg3: memref<128x512xbf16, #tpu.memory_space<vmem>>, %arg4: memref<1x512xf32, #tpu.memory_space<vmem>>, %arg5: memref<128x128xbf16, #tpu.memory_space<vmem>>, %arg6: memref<1x128xf32, #tpu.memory_space<vmem>>, %arg7: memref<128x128xbf16, #tpu.memory_space<vmem>>, %arg8: memref<1x128xf32, #tpu.memory_space<vmem>>, %arg9: memref<128x128xf32, #tpu.memory_space<vmem>>, %arg10: memref<6x128xf32, #tpu.memory_space<vmem>>, %arg11: memref<4x128xf32, #tpu.memory_space<vmem>>, %arg12: memref<8x4x512xf32, #tpu.memory_space<vmem>>) attributes {dimension_semantics = [#tpu.dimension_semantics<parallel>], iteration_bounds = array<i64: 1>, scalar_prefetch = 0 : i64, scratch_operands = 1 : i64, tpu.core_type = #tpu.core_type<tc>, window_params = [{transform_indices = @transform_0, window_bounds = array<i64: 8, 4, 6>}, {pipeline_mode = #tpu.pipeline_mode<synchronous>, transform_indices = @transform_1, window_bounds = array<i64: 6, 512>}, {pipeline_mode = #tpu.pipeline_mode<synchronous>, transform_indices = @transform_2, window_bounds = array<i64: 128, 512>}, {pipeline_mode = #tpu.pipeline_mode<synchronous>, transform_indices = @transform_3, window_bounds = array<i64: 1, 512>}, {pipeline_mode = #tpu.pipeline_mode<synchronous>, transform_indices = @transform_4, window_bounds = array<i64: 128, 128>}, {pipeline_mode = #tpu.pipeline_mode<synchronous>, transform_indices = @transform_5, window_bounds = array<i64: 1, 128>}, {pipeline_mode = #tpu.pipeline_mode<synchronous>, transform_indices = @transform_6, window_bounds = array<i64: 128, 128>}, {pipeline_mode = #tpu.pipeline_mode<synchronous>, transform_indices = @transform_7, window_bounds = array<i64: 1, 128>}, {pipeline_mode = #tpu.pipeline_mode<synchronous>, transform_indices = @transform_8, window_bounds = array<i64: 128, 128>}, {pipeline_mode = #tpu.pipeline_mode<synchronous>, transform_indices = @transform_9, window_bounds = array<i64: 6, 128>}, {transform_indices = @transform_10, window_bounds = array<i64: 4, 128>}]} {
    %c0 = arith.constant 0 : index
    %c0_0 = arith.constant 0 : index
    %0 = vector.load %arg2[%c0, %c0_0] : memref<6x512xbf16, #tpu.memory_space<vmem>>, vector<6x512xbf16>
    %c0_1 = arith.constant 0 : index
    %c0_2 = arith.constant 0 : index
    %1 = vector.load %arg3[%c0_1, %c0_2] : memref<128x512xbf16, #tpu.memory_space<vmem>>, vector<128x512xbf16>
    %c0_3 = arith.constant 0 : index
    %c0_4 = arith.constant 0 : index
    %2 = vector.load %arg4[%c0_3, %c0_4] : memref<1x512xf32, #tpu.memory_space<vmem>>, vector<1x512xf32>
    %c0_5 = arith.constant 0 : index
    %c0_6 = arith.constant 0 : index
    %c0_7 = arith.constant 0 : index
    %3 = vector.load %arg1[%c0_5, %c0_6, %c0_7] : memref<8x4x6xf32, #tpu.memory_space<vmem>>, vector<1x4x6xf32>
    %4 = vector.shape_cast %3 : vector<1x4x6xf32> to vector<4x6xf32>
    %5 = arith.truncf %4 : vector<4x6xf32> to vector<4x6xbf16>
    %cst = arith.constant dense<0.000000e+00> : vector<4x512xf32>
    %6 = tpu.matmul %5, %0, %cst {dimension_numbers = #tpu.dot_dimension_numbers<[1], [0], [0], [1], [0, 0, 1, 1], [], []>} : vector<4x6xbf16>, vector<6x512xbf16>, vector<4x512xf32> -> vector<4x512xf32>
    %7 = vector.broadcast %2 : vector<1x512xf32> to vector<4x512xf32>
    %8 = arith.addf %6, %7 : vector<4x512xf32>
    %c0_8 = arith.constant 0 : index
    %c0_9 = arith.constant 0 : index
    %c0_10 = arith.constant 0 : index
    %9 = vector.load %arg12[%c0_8, %c0_9, %c0_10] : memref<8x4x512xf32, #tpu.memory_space<vmem>>, vector<1x4x512xf32>
    %10 = vector.shape_cast %9 : vector<1x4x512xf32> to vector<4x512xf32>
    %11 = vector.shape_cast %8 : vector<4x512xf32> to vector<1x4x512xf32>
    tpu.vector_store %arg12[%c0_8, %c0_9, %c0_10], %11 {strides = array<i32>} : memref<8x4x512xf32, #tpu.memory_space<vmem>>, vector<1x4x512xf32>,
    %c1 = arith.constant 1 : index
    %c0_11 = arith.constant 0 : index
    %c0_12 = arith.constant 0 : index
    %12 = vector.load %arg1[%c1, %c0_11, %c0_12] : memref<8x4x6xf32, #tpu.memory_space<vmem>>, vector<1x4x6xf32>
    %13 = vector.shape_cast %12 : vector<1x4x6xf32> to vector<4x6xf32>
    %14 = arith.truncf %13 : vector<4x6xf32> to vector<4x6xbf16>
    %cst_13 = arith.constant dense<0.000000e+00> : vector<4x512xf32>
    %15 = tpu.matmul %14, %0, %cst_13 {dimension_numbers = #tpu.dot_dimension_numbers<[1], [0], [0], [1], [0, 0, 1, 1], [], []>} : vector<4x6xbf16>, vector<6x512xbf16>, vector<4x512xf32> -> vector<4x512xf32>
    %16 = vector.broadcast %2 : vector<1x512xf32> to vector<4x512xf32>
    %17 = arith.addf %15, %16 : vector<4x512xf32>
    %c1_14 = arith.constant 1 : index
    %c0_15 = arith.constant 0 : index
    %c0_16 = arith.constant 0 : index
    %18 = vector.load %arg12[%c1_14, %c0_15, %c0_16] : memref<8x4x512xf32, #tpu.memory_space<vmem>>, vector<1x4x512xf32>
    %19 = vector.shape_cast %18 : vector<1x4x512xf32> to vector<4x512xf32>
    %20 = vector.shape_cast %17 : vector<4x512xf32> to vector<1x4x512xf32>
    tpu.vector_store %arg12[%c1_14, %c0_15, %c0_16], %20 {strides = array<i32>} : memref<8x4x512xf32, #tpu.memory_space<vmem>>, vector<1x4x512xf32>,
    %c2 = arith.constant 2 : index
    %c0_17 = arith.constant 0 : index
    %c0_18 = arith.constant 0 : index
    %21 = vector.load %arg1[%c2, %c0_17, %c0_18] : memref<8x4x6xf32, #tpu.memory_space<vmem>>, vector<1x4x6xf32>
    %22 = vector.shape_cast %21 : vector<1x4x6xf32> to vector<4x6xf32>
    %23 = arith.truncf %22 : vector<4x6xf32> to vector<4x6xbf16>
    %cst_19 = arith.constant dense<0.000000e+00> : vector<4x512xf32>
    %24 = tpu.matmul %23, %0, %cst_19 {dimension_numbers = #tpu.dot_dimension_numbers<[1], [0], [0], [1], [0, 0, 1, 1], [], []>} : vector<4x6xbf16>, vector<6x512xbf16>, vector<4x512xf32> -> vector<4x512xf32>
    %25 = vector.broadcast %2 : vector<1x512xf32> to vector<4x512xf32>
    %26 = arith.addf %24, %25 : vector<4x512xf32>
    %c2_20 = arith.constant 2 : index
    %c0_21 = arith.constant 0 : index
    %c0_22 = arith.constant 0 : index
    %27 = vector.load %arg12[%c2_20, %c0_21, %c0_22] : memref<8x4x512xf32, #tpu.memory_space<vmem>>, vector<1x4x512xf32>
    %28 = vector.shape_cast %27 : vector<1x4x512xf32> to vector<4x512xf32>
    %29 = vector.shape_cast %26 : vector<4x512xf32> to vector<1x4x512xf32>
    tpu.vector_store %arg12[%c2_20, %c0_21, %c0_22], %29 {strides = array<i32>} : memref<8x4x512xf32, #tpu.memory_space<vmem>>, vector<1x4x512xf32>,
    %c3 = arith.constant 3 : index
    %c0_23 = arith.constant 0 : index
    %c0_24 = arith.constant 0 : index
    %30 = vector.load %arg1[%c3, %c0_23, %c0_24] : memref<8x4x6xf32, #tpu.memory_space<vmem>>, vector<1x4x6xf32>
    %31 = vector.shape_cast %30 : vector<1x4x6xf32> to vector<4x6xf32>
    %32 = arith.truncf %31 : vector<4x6xf32> to vector<4x6xbf16>
    %cst_25 = arith.constant dense<0.000000e+00> : vector<4x512xf32>
    %33 = tpu.matmul %32, %0, %cst_25 {dimension_numbers = #tpu.dot_dimension_numbers<[1], [0], [0], [1], [0, 0, 1, 1], [], []>} : vector<4x6xbf16>, vector<6x512xbf16>, vector<4x512xf32> -> vector<4x512xf32>
    %34 = vector.broadcast %2 : vector<1x512xf32> to vector<4x512xf32>
    %35 = arith.addf %33, %34 : vector<4x512xf32>
    %c3_26 = arith.constant 3 : index
    %c0_27 = arith.constant 0 : index
    %c0_28 = arith.constant 0 : index
    %36 = vector.load %arg12[%c3_26, %c0_27, %c0_28] : memref<8x4x512xf32, #tpu.memory_space<vmem>>, vector<1x4x512xf32>
    %37 = vector.shape_cast %36 : vector<1x4x512xf32> to vector<4x512xf32>
    %38 = vector.shape_cast %35 : vector<4x512xf32> to vector<1x4x512xf32>
    tpu.vector_store %arg12[%c3_26, %c0_27, %c0_28], %38 {strides = array<i32>} : memref<8x4x512xf32, #tpu.memory_space<vmem>>, vector<1x4x512xf32>,
    %c4 = arith.constant 4 : index
    %c0_29 = arith.constant 0 : index
    %c0_30 = arith.constant 0 : index
    %39 = vector.load %arg1[%c4, %c0_29, %c0_30] : memref<8x4x6xf32, #tpu.memory_space<vmem>>, vector<1x4x6xf32>
    %40 = vector.shape_cast %39 : vector<1x4x6xf32> to vector<4x6xf32>
    %41 = arith.truncf %40 : vector<4x6xf32> to vector<4x6xbf16>
    %cst_31 = arith.constant dense<0.000000e+00> : vector<4x512xf32>
    %42 = tpu.matmul %41, %0, %cst_31 {dimension_numbers = #tpu.dot_dimension_numbers<[1], [0], [0], [1], [0, 0, 1, 1], [], []>} : vector<4x6xbf16>, vector<6x512xbf16>, vector<4x512xf32> -> vector<4x512xf32>
    %43 = vector.broadcast %2 : vector<1x512xf32> to vector<4x512xf32>
    %44 = arith.addf %42, %43 : vector<4x512xf32>
    %c4_32 = arith.constant 4 : index
    %c0_33 = arith.constant 0 : index
    %c0_34 = arith.constant 0 : index
    %45 = vector.load %arg12[%c4_32, %c0_33, %c0_34] : memref<8x4x512xf32, #tpu.memory_space<vmem>>, vector<1x4x512xf32>
    %46 = vector.shape_cast %45 : vector<1x4x512xf32> to vector<4x512xf32>
    %47 = vector.shape_cast %44 : vector<4x512xf32> to vector<1x4x512xf32>
    tpu.vector_store %arg12[%c4_32, %c0_33, %c0_34], %47 {strides = array<i32>} : memref<8x4x512xf32, #tpu.memory_space<vmem>>, vector<1x4x512xf32>,
    %c5 = arith.constant 5 : index
    %c0_35 = arith.constant 0 : index
    %c0_36 = arith.constant 0 : index
    %48 = vector.load %arg1[%c5, %c0_35, %c0_36] : memref<8x4x6xf32, #tpu.memory_space<vmem>>, vector<1x4x6xf32>
    %49 = vector.shape_cast %48 : vector<1x4x6xf32> to vector<4x6xf32>
    %50 = arith.truncf %49 : vector<4x6xf32> to vector<4x6xbf16>
    %cst_37 = arith.constant dense<0.000000e+00> : vector<4x512xf32>
    %51 = tpu.matmul %50, %0, %cst_37 {dimension_numbers = #tpu.dot_dimension_numbers<[1], [0], [0], [1], [0, 0, 1, 1], [], []>} : vector<4x6xbf16>, vector<6x512xbf16>, vector<4x512xf32> -> vector<4x512xf32>
    %52 = vector.broadcast %2 : vector<1x512xf32> to vector<4x512xf32>
    %53 = arith.addf %51, %52 : vector<4x512xf32>
    %c5_38 = arith.constant 5 : index
    %c0_39 = arith.constant 0 : index
    %c0_40 = arith.constant 0 : index
    %54 = vector.load %arg12[%c5_38, %c0_39, %c0_40] : memref<8x4x512xf32, #tpu.memory_space<vmem>>, vector<1x4x512xf32>
    %55 = vector.shape_cast %54 : vector<1x4x512xf32> to vector<4x512xf32>
    %56 = vector.shape_cast %53 : vector<4x512xf32> to vector<1x4x512xf32>
    tpu.vector_store %arg12[%c5_38, %c0_39, %c0_40], %56 {strides = array<i32>} : memref<8x4x512xf32, #tpu.memory_space<vmem>>, vector<1x4x512xf32>,
    %c6 = arith.constant 6 : index
    %c0_41 = arith.constant 0 : index
    %c0_42 = arith.constant 0 : index
    %57 = vector.load %arg1[%c6, %c0_41, %c0_42] : memref<8x4x6xf32, #tpu.memory_space<vmem>>, vector<1x4x6xf32>
    %58 = vector.shape_cast %57 : vector<1x4x6xf32> to vector<4x6xf32>
    %59 = arith.truncf %58 : vector<4x6xf32> to vector<4x6xbf16>
    %cst_43 = arith.constant dense<0.000000e+00> : vector<4x512xf32>
    %60 = tpu.matmul %59, %0, %cst_43 {dimension_numbers = #tpu.dot_dimension_numbers<[1], [0], [0], [1], [0, 0, 1, 1], [], []>} : vector<4x6xbf16>, vector<6x512xbf16>, vector<4x512xf32> -> vector<4x512xf32>
    %61 = vector.broadcast %2 : vector<1x512xf32> to vector<4x512xf32>
    %62 = arith.addf %60, %61 : vector<4x512xf32>
    %c6_44 = arith.constant 6 : index
    %c0_45 = arith.constant 0 : index
    %c0_46 = arith.constant 0 : index
    %63 = vector.load %arg12[%c6_44, %c0_45, %c0_46] : memref<8x4x512xf32, #tpu.memory_space<vmem>>, vector<1x4x512xf32>
    %64 = vector.shape_cast %63 : vector<1x4x512xf32> to vector<4x512xf32>
    %65 = vector.shape_cast %62 : vector<4x512xf32> to vector<1x4x512xf32>
    tpu.vector_store %arg12[%c6_44, %c0_45, %c0_46], %65 {strides = array<i32>} : memref<8x4x512xf32, #tpu.memory_space<vmem>>, vector<1x4x512xf32>,
    %c7 = arith.constant 7 : index
    %c0_47 = arith.constant 0 : index
    %c0_48 = arith.constant 0 : index
    %66 = vector.load %arg1[%c7, %c0_47, %c0_48] : memref<8x4x6xf32, #tpu.memory_space<vmem>>, vector<1x4x6xf32>
    %67 = vector.shape_cast %66 : vector<1x4x6xf32> to vector<4x6xf32>
    %68 = arith.truncf %67 : vector<4x6xf32> to vector<4x6xbf16>
    %cst_49 = arith.constant dense<0.000000e+00> : vector<4x512xf32>
    %69 = tpu.matmul %68, %0, %cst_49 {dimension_numbers = #tpu.dot_dimension_numbers<[1], [0], [0], [1], [0, 0, 1, 1], [], []>} : vector<4x6xbf16>, vector<6x512xbf16>, vector<4x512xf32> -> vector<4x512xf32>
    %70 = vector.broadcast %2 : vector<1x512xf32> to vector<4x512xf32>
    %71 = arith.addf %69, %70 : vector<4x512xf32>
    %c7_50 = arith.constant 7 : index
    %c0_51 = arith.constant 0 : index
    %c0_52 = arith.constant 0 : index
    %72 = vector.load %arg12[%c7_50, %c0_51, %c0_52] : memref<8x4x512xf32, #tpu.memory_space<vmem>>, vector<1x4x512xf32>
    %73 = vector.shape_cast %72 : vector<1x4x512xf32> to vector<4x512xf32>
    %74 = vector.shape_cast %71 : vector<4x512xf32> to vector<1x4x512xf32>
    tpu.vector_store %arg12[%c7_50, %c0_51, %c0_52], %74 {strides = array<i32>} : memref<8x4x512xf32, #tpu.memory_space<vmem>>, vector<1x4x512xf32>,
    %cst_53 = arith.constant 0.000000e+00 : f32
    %75 = vector.broadcast %cst_53 : f32 to vector<4x128xf32>
    %cst_54 = arith.constant 0.000000e+00 : f32
    %76 = vector.broadcast %cst_54 : f32 to vector<4x128xf32>
    %c0_i32 = arith.constant 0 : i32
    %77 = arith.index_cast %c0_i32 : i32 to index
    %c0_55 = arith.constant 0 : index
    %c0_56 = arith.constant 0 : index
    %78 = vector.load %arg12[%77, %c0_55, %c0_56] : memref<8x4x512xf32, #tpu.memory_space<vmem>>, vector<1x4x512xf32>
    %79 = vector.shape_cast %78 : vector<1x4x512xf32> to vector<4x512xf32>
    %80 = arith.truncf %75 : vector<4x128xf32> to vector<4x128xbf16>
    %cst_57 = arith.constant dense<0.000000e+00> : vector<4x512xf32>
    %81 = tpu.matmul %80, %1, %cst_57 {dimension_numbers = #tpu.dot_dimension_numbers<[1], [0], [0], [1], [0, 0, 1, 1], [], []>} : vector<4x128xbf16>, vector<128x512xbf16>, vector<4x512xf32> -> vector<4x512xf32>
    %82 = arith.addf %79, %81 : vector<4x512xf32>
    %83 = vector.extract_strided_slice %82 {offsets = [0, 0], sizes = [4, 128], strides = [1, 1]} : vector<4x512xf32> to vector<4x128xf32>
    %cst_58 = arith.constant 5.000000e-01 : f32
    %84 = vector.broadcast %cst_58 : f32 to vector<4x128xf32>
    %85 = arith.mulf %84, %83 : vector<4x128xf32>
    %86 = math.tanh %85 : vector<4x128xf32>
    %cst_59 = arith.constant 5.000000e-01 : f32
    %87 = vector.broadcast %cst_59 : f32 to vector<4x128xf32>
    %88 = arith.mulf %87, %86 : vector<4x128xf32>
    %cst_60 = arith.constant 5.000000e-01 : f32
    %89 = vector.broadcast %cst_60 : f32 to vector<4x128xf32>
    %90 = arith.addf %88, %89 : vector<4x128xf32>
    %91 = vector.extract_strided_slice %82 {offsets = [0, 128], sizes = [4, 128], strides = [1, 1]} : vector<4x512xf32> to vector<4x128xf32>
    %cst_61 = arith.constant 5.000000e-01 : f32
    %92 = vector.broadcast %cst_61 : f32 to vector<4x128xf32>
    %93 = arith.mulf %92, %91 : vector<4x128xf32>
    %94 = math.tanh %93 : vector<4x128xf32>
    %cst_62 = arith.constant 5.000000e-01 : f32
    %95 = vector.broadcast %cst_62 : f32 to vector<4x128xf32>
    %96 = arith.mulf %95, %94 : vector<4x128xf32>
    %cst_63 = arith.constant 5.000000e-01 : f32
    %97 = vector.broadcast %cst_63 : f32 to vector<4x128xf32>
    %98 = arith.addf %96, %97 : vector<4x128xf32>
    %99 = vector.extract_strided_slice %82 {offsets = [0, 256], sizes = [4, 128], strides = [1, 1]} : vector<4x512xf32> to vector<4x128xf32>
    %100 = math.tanh %99 : vector<4x128xf32>
    %101 = vector.extract_strided_slice %82 {offsets = [0, 384], sizes = [4, 128], strides = [1, 1]} : vector<4x512xf32> to vector<4x128xf32>
    %cst_64 = arith.constant 5.000000e-01 : f32
    %102 = vector.broadcast %cst_64 : f32 to vector<4x128xf32>
    %103 = arith.mulf %102, %101 : vector<4x128xf32>
    %104 = math.tanh %103 : vector<4x128xf32>
    %cst_65 = arith.constant 5.000000e-01 : f32
    %105 = vector.broadcast %cst_65 : f32 to vector<4x128xf32>
    %106 = arith.mulf %105, %104 : vector<4x128xf32>
    %cst_66 = arith.constant 5.000000e-01 : f32
    %107 = vector.broadcast %cst_66 : f32 to vector<4x128xf32>
    %108 = arith.addf %106, %107 : vector<4x128xf32>
    %109 = arith.mulf %98, %76 : vector<4x128xf32>
    %110 = arith.mulf %90, %100 : vector<4x128xf32>
    %111 = arith.addf %109, %110 : vector<4x128xf32>
    %112 = math.tanh %111 : vector<4x128xf32>
    %113 = arith.mulf %108, %112 : vector<4x128xf32>
    %c1_i32 = arith.constant 1 : i32
    %114 = arith.index_cast %c1_i32 : i32 to index
    %c0_67 = arith.constant 0 : index
    %c0_68 = arith.constant 0 : index
    %115 = vector.load %arg12[%114, %c0_67, %c0_68] : memref<8x4x512xf32, #tpu.memory_space<vmem>>, vector<1x4x512xf32>
    %116 = vector.shape_cast %115 : vector<1x4x512xf32> to vector<4x512xf32>
    %117 = arith.truncf %113 : vector<4x128xf32> to vector<4x128xbf16>
    %cst_69 = arith.constant dense<0.000000e+00> : vector<4x512xf32>
    %118 = tpu.matmul %117, %1, %cst_69 {dimension_numbers = #tpu.dot_dimension_numbers<[1], [0], [0], [1], [0, 0, 1, 1], [], []>} : vector<4x128xbf16>, vector<128x512xbf16>, vector<4x512xf32> -> vector<4x512xf32>
    %119 = arith.addf %116, %118 : vector<4x512xf32>
    %120 = vector.extract_strided_slice %119 {offsets = [0, 0], sizes = [4, 128], strides = [1, 1]} : vector<4x512xf32> to vector<4x128xf32>
    %cst_70 = arith.constant 5.000000e-01 : f32
    %121 = vector.broadcast %cst_70 : f32 to vector<4x128xf32>
    %122 = arith.mulf %121, %120 : vector<4x128xf32>
    %123 = math.tanh %122 : vector<4x128xf32>
    %cst_71 = arith.constant 5.000000e-01 : f32
    %124 = vector.broadcast %cst_71 : f32 to vector<4x128xf32>
    %125 = arith.mulf %124, %123 : vector<4x128xf32>
    %cst_72 = arith.constant 5.000000e-01 : f32
    %126 = vector.broadcast %cst_72 : f32 to vector<4x128xf32>
    %127 = arith.addf %125, %126 : vector<4x128xf32>
    %128 = vector.extract_strided_slice %119 {offsets = [0, 128], sizes = [4, 128], strides = [1, 1]} : vector<4x512xf32> to vector<4x128xf32>
    %cst_73 = arith.constant 5.000000e-01 : f32
    %129 = vector.broadcast %cst_73 : f32 to vector<4x128xf32>
    %130 = arith.mulf %129, %128 : vector<4x128xf32>
    %131 = math.tanh %130 : vector<4x128xf32>
    %cst_74 = arith.constant 5.000000e-01 : f32
    %132 = vector.broadcast %cst_74 : f32 to vector<4x128xf32>
    %133 = arith.mulf %132, %131 : vector<4x128xf32>
    %cst_75 = arith.constant 5.000000e-01 : f32
    %134 = vector.broadcast %cst_75 : f32 to vector<4x128xf32>
    %135 = arith.addf %133, %134 : vector<4x128xf32>
    %136 = vector.extract_strided_slice %119 {offsets = [0, 256], sizes = [4, 128], strides = [1, 1]} : vector<4x512xf32> to vector<4x128xf32>
    %137 = math.tanh %136 : vector<4x128xf32>
    %138 = vector.extract_strided_slice %119 {offsets = [0, 384], sizes = [4, 128], strides = [1, 1]} : vector<4x512xf32> to vector<4x128xf32>
    %cst_76 = arith.constant 5.000000e-01 : f32
    %139 = vector.broadcast %cst_76 : f32 to vector<4x128xf32>
    %140 = arith.mulf %139, %138 : vector<4x128xf32>
    %141 = math.tanh %140 : vector<4x128xf32>
    %cst_77 = arith.constant 5.000000e-01 : f32
    %142 = vector.broadcast %cst_77 : f32 to vector<4x128xf32>
    %143 = arith.mulf %142, %141 : vector<4x128xf32>
    %cst_78 = arith.constant 5.000000e-01 : f32
    %144 = vector.broadcast %cst_78 : f32 to vector<4x128xf32>
    %145 = arith.addf %143, %144 : vector<4x128xf32>
    %146 = arith.mulf %135, %111 : vector<4x128xf32>
    %147 = arith.mulf %127, %137 : vector<4x128xf32>
    %148 = arith.addf %146, %147 : vector<4x128xf32>
    %149 = math.tanh %148 : vector<4x128xf32>
    %150 = arith.mulf %145, %149 : vector<4x128xf32>
    %c2_i32 = arith.constant 2 : i32
    %151 = arith.index_cast %c2_i32 : i32 to index
    %c0_79 = arith.constant 0 : index
    %c0_80 = arith.constant 0 : index
    %152 = vector.load %arg12[%151, %c0_79, %c0_80] : memref<8x4x512xf32, #tpu.memory_space<vmem>>, vector<1x4x512xf32>
    %153 = vector.shape_cast %152 : vector<1x4x512xf32> to vector<4x512xf32>
    %154 = arith.truncf %150 : vector<4x128xf32> to vector<4x128xbf16>
    %cst_81 = arith.constant dense<0.000000e+00> : vector<4x512xf32>
    %155 = tpu.matmul %154, %1, %cst_81 {dimension_numbers = #tpu.dot_dimension_numbers<[1], [0], [0], [1], [0, 0, 1, 1], [], []>} : vector<4x128xbf16>, vector<128x512xbf16>, vector<4x512xf32> -> vector<4x512xf32>
    %156 = arith.addf %153, %155 : vector<4x512xf32>
    %157 = vector.extract_strided_slice %156 {offsets = [0, 0], sizes = [4, 128], strides = [1, 1]} : vector<4x512xf32> to vector<4x128xf32>
    %cst_82 = arith.constant 5.000000e-01 : f32
    %158 = vector.broadcast %cst_82 : f32 to vector<4x128xf32>
    %159 = arith.mulf %158, %157 : vector<4x128xf32>
    %160 = math.tanh %159 : vector<4x128xf32>
    %cst_83 = arith.constant 5.000000e-01 : f32
    %161 = vector.broadcast %cst_83 : f32 to vector<4x128xf32>
    %162 = arith.mulf %161, %160 : vector<4x128xf32>
    %cst_84 = arith.constant 5.000000e-01 : f32
    %163 = vector.broadcast %cst_84 : f32 to vector<4x128xf32>
    %164 = arith.addf %162, %163 : vector<4x128xf32>
    %165 = vector.extract_strided_slice %156 {offsets = [0, 128], sizes = [4, 128], strides = [1, 1]} : vector<4x512xf32> to vector<4x128xf32>
    %cst_85 = arith.constant 5.000000e-01 : f32
    %166 = vector.broadcast %cst_85 : f32 to vector<4x128xf32>
    %167 = arith.mulf %166, %165 : vector<4x128xf32>
    %168 = math.tanh %167 : vector<4x128xf32>
    %cst_86 = arith.constant 5.000000e-01 : f32
    %169 = vector.broadcast %cst_86 : f32 to vector<4x128xf32>
    %170 = arith.mulf %169, %168 : vector<4x128xf32>
    %cst_87 = arith.constant 5.000000e-01 : f32
    %171 = vector.broadcast %cst_87 : f32 to vector<4x128xf32>
    %172 = arith.addf %170, %171 : vector<4x128xf32>
    %173 = vector.extract_strided_slice %156 {offsets = [0, 256], sizes = [4, 128], strides = [1, 1]} : vector<4x512xf32> to vector<4x128xf32>
    %174 = math.tanh %173 : vector<4x128xf32>
    %175 = vector.extract_strided_slice %156 {offsets = [0, 384], sizes = [4, 128], strides = [1, 1]} : vector<4x512xf32> to vector<4x128xf32>
    %cst_88 = arith.constant 5.000000e-01 : f32
    %176 = vector.broadcast %cst_88 : f32 to vector<4x128xf32>
    %177 = arith.mulf %176, %175 : vector<4x128xf32>
    %178 = math.tanh %177 : vector<4x128xf32>
    %cst_89 = arith.constant 5.000000e-01 : f32
    %179 = vector.broadcast %cst_89 : f32 to vector<4x128xf32>
    %180 = arith.mulf %179, %178 : vector<4x128xf32>
    %cst_90 = arith.constant 5.000000e-01 : f32
    %181 = vector.broadcast %cst_90 : f32 to vector<4x128xf32>
    %182 = arith.addf %180, %181 : vector<4x128xf32>
    %183 = arith.mulf %172, %148 : vector<4x128xf32>
    %184 = arith.mulf %164, %174 : vector<4x128xf32>
    %185 = arith.addf %183, %184 : vector<4x128xf32>
    %186 = math.tanh %185 : vector<4x128xf32>
    %187 = arith.mulf %182, %186 : vector<4x128xf32>
    %c3_i32 = arith.constant 3 : i32
    %188 = arith.index_cast %c3_i32 : i32 to index
    %c0_91 = arith.constant 0 : index
    %c0_92 = arith.constant 0 : index
    %189 = vector.load %arg12[%188, %c0_91, %c0_92] : memref<8x4x512xf32, #tpu.memory_space<vmem>>, vector<1x4x512xf32>
    %190 = vector.shape_cast %189 : vector<1x4x512xf32> to vector<4x512xf32>
    %191 = arith.truncf %187 : vector<4x128xf32> to vector<4x128xbf16>
    %cst_93 = arith.constant dense<0.000000e+00> : vector<4x512xf32>
    %192 = tpu.matmul %191, %1, %cst_93 {dimension_numbers = #tpu.dot_dimension_numbers<[1], [0], [0], [1], [0, 0, 1, 1], [], []>} : vector<4x128xbf16>, vector<128x512xbf16>, vector<4x512xf32> -> vector<4x512xf32>
    %193 = arith.addf %190, %192 : vector<4x512xf32>
    %194 = vector.extract_strided_slice %193 {offsets = [0, 0], sizes = [4, 128], strides = [1, 1]} : vector<4x512xf32> to vector<4x128xf32>
    %cst_94 = arith.constant 5.000000e-01 : f32
    %195 = vector.broadcast %cst_94 : f32 to vector<4x128xf32>
    %196 = arith.mulf %195, %194 : vector<4x128xf32>
    %197 = math.tanh %196 : vector<4x128xf32>
    %cst_95 = arith.constant 5.000000e-01 : f32
    %198 = vector.broadcast %cst_95 : f32 to vector<4x128xf32>
    %199 = arith.mulf %198, %197 : vector<4x128xf32>
    %cst_96 = arith.constant 5.000000e-01 : f32
    %200 = vector.broadcast %cst_96 : f32 to vector<4x128xf32>
    %201 = arith.addf %199, %200 : vector<4x128xf32>
    %202 = vector.extract_strided_slice %193 {offsets = [0, 128], sizes = [4, 128], strides = [1, 1]} : vector<4x512xf32> to vector<4x128xf32>
    %cst_97 = arith.constant 5.000000e-01 : f32
    %203 = vector.broadcast %cst_97 : f32 to vector<4x128xf32>
    %204 = arith.mulf %203, %202 : vector<4x128xf32>
    %205 = math.tanh %204 : vector<4x128xf32>
    %cst_98 = arith.constant 5.000000e-01 : f32
    %206 = vector.broadcast %cst_98 : f32 to vector<4x128xf32>
    %207 = arith.mulf %206, %205 : vector<4x128xf32>
    %cst_99 = arith.constant 5.000000e-01 : f32
    %208 = vector.broadcast %cst_99 : f32 to vector<4x128xf32>
    %209 = arith.addf %207, %208 : vector<4x128xf32>
    %210 = vector.extract_strided_slice %193 {offsets = [0, 256], sizes = [4, 128], strides = [1, 1]} : vector<4x512xf32> to vector<4x128xf32>
    %211 = math.tanh %210 : vector<4x128xf32>
    %212 = vector.extract_strided_slice %193 {offsets = [0, 384], sizes = [4, 128], strides = [1, 1]} : vector<4x512xf32> to vector<4x128xf32>
    %cst_100 = arith.constant 5.000000e-01 : f32
    %213 = vector.broadcast %cst_100 : f32 to vector<4x128xf32>
    %214 = arith.mulf %213, %212 : vector<4x128xf32>
    %215 = math.tanh %214 : vector<4x128xf32>
    %cst_101 = arith.constant 5.000000e-01 : f32
    %216 = vector.broadcast %cst_101 : f32 to vector<4x128xf32>
    %217 = arith.mulf %216, %215 : vector<4x128xf32>
    %cst_102 = arith.constant 5.000000e-01 : f32
    %218 = vector.broadcast %cst_102 : f32 to vector<4x128xf32>
    %219 = arith.addf %217, %218 : vector<4x128xf32>
    %220 = arith.mulf %209, %185 : vector<4x128xf32>
    %221 = arith.mulf %201, %211 : vector<4x128xf32>
    %222 = arith.addf %220, %221 : vector<4x128xf32>
    %223 = math.tanh %222 : vector<4x128xf32>
    %224 = arith.mulf %219, %223 : vector<4x128xf32>
    %c4_i32 = arith.constant 4 : i32
    %225 = arith.index_cast %c4_i32 : i32 to index
    %c0_103 = arith.constant 0 : index
    %c0_104 = arith.constant 0 : index
    %226 = vector.load %arg12[%225, %c0_103, %c0_104] : memref<8x4x512xf32, #tpu.memory_space<vmem>>, vector<1x4x512xf32>
    %227 = vector.shape_cast %226 : vector<1x4x512xf32> to vector<4x512xf32>
    %228 = arith.truncf %224 : vector<4x128xf32> to vector<4x128xbf16>
    %cst_105 = arith.constant dense<0.000000e+00> : vector<4x512xf32>
    %229 = tpu.matmul %228, %1, %cst_105 {dimension_numbers = #tpu.dot_dimension_numbers<[1], [0], [0], [1], [0, 0, 1, 1], [], []>} : vector<4x128xbf16>, vector<128x512xbf16>, vector<4x512xf32> -> vector<4x512xf32>
    %230 = arith.addf %227, %229 : vector<4x512xf32>
    %231 = vector.extract_strided_slice %230 {offsets = [0, 0], sizes = [4, 128], strides = [1, 1]} : vector<4x512xf32> to vector<4x128xf32>
    %cst_106 = arith.constant 5.000000e-01 : f32
    %232 = vector.broadcast %cst_106 : f32 to vector<4x128xf32>
    %233 = arith.mulf %232, %231 : vector<4x128xf32>
    %234 = math.tanh %233 : vector<4x128xf32>
    %cst_107 = arith.constant 5.000000e-01 : f32
    %235 = vector.broadcast %cst_107 : f32 to vector<4x128xf32>
    %236 = arith.mulf %235, %234 : vector<4x128xf32>
    %cst_108 = arith.constant 5.000000e-01 : f32
    %237 = vector.broadcast %cst_108 : f32 to vector<4x128xf32>
    %238 = arith.addf %236, %237 : vector<4x128xf32>
    %239 = vector.extract_strided_slice %230 {offsets = [0, 128], sizes = [4, 128], strides = [1, 1]} : vector<4x512xf32> to vector<4x128xf32>
    %cst_109 = arith.constant 5.000000e-01 : f32
    %240 = vector.broadcast %cst_109 : f32 to vector<4x128xf32>
    %241 = arith.mulf %240, %239 : vector<4x128xf32>
    %242 = math.tanh %241 : vector<4x128xf32>
    %cst_110 = arith.constant 5.000000e-01 : f32
    %243 = vector.broadcast %cst_110 : f32 to vector<4x128xf32>
    %244 = arith.mulf %243, %242 : vector<4x128xf32>
    %cst_111 = arith.constant 5.000000e-01 : f32
    %245 = vector.broadcast %cst_111 : f32 to vector<4x128xf32>
    %246 = arith.addf %244, %245 : vector<4x128xf32>
    %247 = vector.extract_strided_slice %230 {offsets = [0, 256], sizes = [4, 128], strides = [1, 1]} : vector<4x512xf32> to vector<4x128xf32>
    %248 = math.tanh %247 : vector<4x128xf32>
    %249 = vector.extract_strided_slice %230 {offsets = [0, 384], sizes = [4, 128], strides = [1, 1]} : vector<4x512xf32> to vector<4x128xf32>
    %cst_112 = arith.constant 5.000000e-01 : f32
    %250 = vector.broadcast %cst_112 : f32 to vector<4x128xf32>
    %251 = arith.mulf %250, %249 : vector<4x128xf32>
    %252 = math.tanh %251 : vector<4x128xf32>
    %cst_113 = arith.constant 5.000000e-01 : f32
    %253 = vector.broadcast %cst_113 : f32 to vector<4x128xf32>
    %254 = arith.mulf %253, %252 : vector<4x128xf32>
    %cst_114 = arith.constant 5.000000e-01 : f32
    %255 = vector.broadcast %cst_114 : f32 to vector<4x128xf32>
    %256 = arith.addf %254, %255 : vector<4x128xf32>
    %257 = arith.mulf %246, %222 : vector<4x128xf32>
    %258 = arith.mulf %238, %248 : vector<4x128xf32>
    %259 = arith.addf %257, %258 : vector<4x128xf32>
    %260 = math.tanh %259 : vector<4x128xf32>
    %261 = arith.mulf %256, %260 : vector<4x128xf32>
    %c5_i32 = arith.constant 5 : i32
    %262 = arith.index_cast %c5_i32 : i32 to index
    %c0_115 = arith.constant 0 : index
    %c0_116 = arith.constant 0 : index
    %263 = vector.load %arg12[%262, %c0_115, %c0_116] : memref<8x4x512xf32, #tpu.memory_space<vmem>>, vector<1x4x512xf32>
    %264 = vector.shape_cast %263 : vector<1x4x512xf32> to vector<4x512xf32>
    %265 = arith.truncf %261 : vector<4x128xf32> to vector<4x128xbf16>
    %cst_117 = arith.constant dense<0.000000e+00> : vector<4x512xf32>
    %266 = tpu.matmul %265, %1, %cst_117 {dimension_numbers = #tpu.dot_dimension_numbers<[1], [0], [0], [1], [0, 0, 1, 1], [], []>} : vector<4x128xbf16>, vector<128x512xbf16>, vector<4x512xf32> -> vector<4x512xf32>
    %267 = arith.addf %264, %266 : vector<4x512xf32>
    %268 = vector.extract_strided_slice %267 {offsets = [0, 0], sizes = [4, 128], strides = [1, 1]} : vector<4x512xf32> to vector<4x128xf32>
    %cst_118 = arith.constant 5.000000e-01 : f32
    %269 = vector.broadcast %cst_118 : f32 to vector<4x128xf32>
    %270 = arith.mulf %269, %268 : vector<4x128xf32>
    %271 = math.tanh %270 : vector<4x128xf32>
    %cst_119 = arith.constant 5.000000e-01 : f32
    %272 = vector.broadcast %cst_119 : f32 to vector<4x128xf32>
    %273 = arith.mulf %272, %271 : vector<4x128xf32>
    %cst_120 = arith.constant 5.000000e-01 : f32
    %274 = vector.broadcast %cst_120 : f32 to vector<4x128xf32>
    %275 = arith.addf %273, %274 : vector<4x128xf32>
    %276 = vector.extract_strided_slice %267 {offsets = [0, 128], sizes = [4, 128], strides = [1, 1]} : vector<4x512xf32> to vector<4x128xf32>
    %cst_121 = arith.constant 5.000000e-01 : f32
    %277 = vector.broadcast %cst_121 : f32 to vector<4x128xf32>
    %278 = arith.mulf %277, %276 : vector<4x128xf32>
    %279 = math.tanh %278 : vector<4x128xf32>
    %cst_122 = arith.constant 5.000000e-01 : f32
    %280 = vector.broadcast %cst_122 : f32 to vector<4x128xf32>
    %281 = arith.mulf %280, %279 : vector<4x128xf32>
    %cst_123 = arith.constant 5.000000e-01 : f32
    %282 = vector.broadcast %cst_123 : f32 to vector<4x128xf32>
    %283 = arith.addf %281, %282 : vector<4x128xf32>
    %284 = vector.extract_strided_slice %267 {offsets = [0, 256], sizes = [4, 128], strides = [1, 1]} : vector<4x512xf32> to vector<4x128xf32>
    %285 = math.tanh %284 : vector<4x128xf32>
    %286 = vector.extract_strided_slice %267 {offsets = [0, 384], sizes = [4, 128], strides = [1, 1]} : vector<4x512xf32> to vector<4x128xf32>
    %cst_124 = arith.constant 5.000000e-01 : f32
    %287 = vector.broadcast %cst_124 : f32 to vector<4x128xf32>
    %288 = arith.mulf %287, %286 : vector<4x128xf32>
    %289 = math.tanh %288 : vector<4x128xf32>
    %cst_125 = arith.constant 5.000000e-01 : f32
    %290 = vector.broadcast %cst_125 : f32 to vector<4x128xf32>
    %291 = arith.mulf %290, %289 : vector<4x128xf32>
    %cst_126 = arith.constant 5.000000e-01 : f32
    %292 = vector.broadcast %cst_126 : f32 to vector<4x128xf32>
    %293 = arith.addf %291, %292 : vector<4x128xf32>
    %294 = arith.mulf %283, %259 : vector<4x128xf32>
    %295 = arith.mulf %275, %285 : vector<4x128xf32>
    %296 = arith.addf %294, %295 : vector<4x128xf32>
    %297 = math.tanh %296 : vector<4x128xf32>
    %298 = arith.mulf %293, %297 : vector<4x128xf32>
    %c6_i32 = arith.constant 6 : i32
    %299 = arith.index_cast %c6_i32 : i32 to index
    %c0_127 = arith.constant 0 : index
    %c0_128 = arith.constant 0 : index
    %300 = vector.load %arg12[%299, %c0_127, %c0_128] : memref<8x4x512xf32, #tpu.memory_space<vmem>>, vector<1x4x512xf32>
    %301 = vector.shape_cast %300 : vector<1x4x512xf32> to vector<4x512xf32>
    %302 = arith.truncf %298 : vector<4x128xf32> to vector<4x128xbf16>
    %cst_129 = arith.constant dense<0.000000e+00> : vector<4x512xf32>
    %303 = tpu.matmul %302, %1, %cst_129 {dimension_numbers = #tpu.dot_dimension_numbers<[1], [0], [0], [1], [0, 0, 1, 1], [], []>} : vector<4x128xbf16>, vector<128x512xbf16>, vector<4x512xf32> -> vector<4x512xf32>
    %304 = arith.addf %301, %303 : vector<4x512xf32>
    %305 = vector.extract_strided_slice %304 {offsets = [0, 0], sizes = [4, 128], strides = [1, 1]} : vector<4x512xf32> to vector<4x128xf32>
    %cst_130 = arith.constant 5.000000e-01 : f32
    %306 = vector.broadcast %cst_130 : f32 to vector<4x128xf32>
    %307 = arith.mulf %306, %305 : vector<4x128xf32>
    %308 = math.tanh %307 : vector<4x128xf32>
    %cst_131 = arith.constant 5.000000e-01 : f32
    %309 = vector.broadcast %cst_131 : f32 to vector<4x128xf32>
    %310 = arith.mulf %309, %308 : vector<4x128xf32>
    %cst_132 = arith.constant 5.000000e-01 : f32
    %311 = vector.broadcast %cst_132 : f32 to vector<4x128xf32>
    %312 = arith.addf %310, %311 : vector<4x128xf32>
    %313 = vector.extract_strided_slice %304 {offsets = [0, 128], sizes = [4, 128], strides = [1, 1]} : vector<4x512xf32> to vector<4x128xf32>
    %cst_133 = arith.constant 5.000000e-01 : f32
    %314 = vector.broadcast %cst_133 : f32 to vector<4x128xf32>
    %315 = arith.mulf %314, %313 : vector<4x128xf32>
    %316 = math.tanh %315 : vector<4x128xf32>
    %cst_134 = arith.constant 5.000000e-01 : f32
    %317 = vector.broadcast %cst_134 : f32 to vector<4x128xf32>
    %318 = arith.mulf %317, %316 : vector<4x128xf32>
    %cst_135 = arith.constant 5.000000e-01 : f32
    %319 = vector.broadcast %cst_135 : f32 to vector<4x128xf32>
    %320 = arith.addf %318, %319 : vector<4x128xf32>
    %321 = vector.extract_strided_slice %304 {offsets = [0, 256], sizes = [4, 128], strides = [1, 1]} : vector<4x512xf32> to vector<4x128xf32>
    %322 = math.tanh %321 : vector<4x128xf32>
    %323 = vector.extract_strided_slice %304 {offsets = [0, 384], sizes = [4, 128], strides = [1, 1]} : vector<4x512xf32> to vector<4x128xf32>
    %cst_136 = arith.constant 5.000000e-01 : f32
    %324 = vector.broadcast %cst_136 : f32 to vector<4x128xf32>
    %325 = arith.mulf %324, %323 : vector<4x128xf32>
    %326 = math.tanh %325 : vector<4x128xf32>
    %cst_137 = arith.constant 5.000000e-01 : f32
    %327 = vector.broadcast %cst_137 : f32 to vector<4x128xf32>
    %328 = arith.mulf %327, %326 : vector<4x128xf32>
    %cst_138 = arith.constant 5.000000e-01 : f32
    %329 = vector.broadcast %cst_138 : f32 to vector<4x128xf32>
    %330 = arith.addf %328, %329 : vector<4x128xf32>
    %331 = arith.mulf %320, %296 : vector<4x128xf32>
    %332 = arith.mulf %312, %322 : vector<4x128xf32>
    %333 = arith.addf %331, %332 : vector<4x128xf32>
    %334 = math.tanh %333 : vector<4x128xf32>
    %335 = arith.mulf %330, %334 : vector<4x128xf32>
    %c7_i32 = arith.constant 7 : i32
    %336 = arith.index_cast %c7_i32 : i32 to index
    %c0_139 = arith.constant 0 : index
    %c0_140 = arith.constant 0 : index
    %337 = vector.load %arg12[%336, %c0_139, %c0_140] : memref<8x4x512xf32, #tpu.memory_space<vmem>>, vector<1x4x512xf32>
    %338 = vector.shape_cast %337 : vector<1x4x512xf32> to vector<4x512xf32>
    %339 = arith.truncf %335 : vector<4x128xf32> to vector<4x128xbf16>
    %cst_141 = arith.constant dense<0.000000e+00> : vector<4x512xf32>
    %340 = tpu.matmul %339, %1, %cst_141 {dimension_numbers = #tpu.dot_dimension_numbers<[1], [0], [0], [1], [0, 0, 1, 1], [], []>} : vector<4x128xbf16>, vector<128x512xbf16>, vector<4x512xf32> -> vector<4x512xf32>
    %341 = arith.addf %338, %340 : vector<4x512xf32>
    %342 = vector.extract_strided_slice %341 {offsets = [0, 0], sizes = [4, 128], strides = [1, 1]} : vector<4x512xf32> to vector<4x128xf32>
    %cst_142 = arith.constant 5.000000e-01 : f32
    %343 = vector.broadcast %cst_142 : f32 to vector<4x128xf32>
    %344 = arith.mulf %343, %342 : vector<4x128xf32>
    %345 = math.tanh %344 : vector<4x128xf32>
    %cst_143 = arith.constant 5.000000e-01 : f32
    %346 = vector.broadcast %cst_143 : f32 to vector<4x128xf32>
    %347 = arith.mulf %346, %345 : vector<4x128xf32>
    %cst_144 = arith.constant 5.000000e-01 : f32
    %348 = vector.broadcast %cst_144 : f32 to vector<4x128xf32>
    %349 = arith.addf %347, %348 : vector<4x128xf32>
    %350 = vector.extract_strided_slice %341 {offsets = [0, 128], sizes = [4, 128], strides = [1, 1]} : vector<4x512xf32> to vector<4x128xf32>
    %cst_145 = arith.constant 5.000000e-01 : f32
    %351 = vector.broadcast %cst_145 : f32 to vector<4x128xf32>
    %352 = arith.mulf %351, %350 : vector<4x128xf32>
    %353 = math.tanh %352 : vector<4x128xf32>
    %cst_146 = arith.constant 5.000000e-01 : f32
    %354 = vector.broadcast %cst_146 : f32 to vector<4x128xf32>
    %355 = arith.mulf %354, %353 : vector<4x128xf32>
    %cst_147 = arith.constant 5.000000e-01 : f32
    %356 = vector.broadcast %cst_147 : f32 to vector<4x128xf32>
    %357 = arith.addf %355, %356 : vector<4x128xf32>
    %358 = vector.extract_strided_slice %341 {offsets = [0, 256], sizes = [4, 128], strides = [1, 1]} : vector<4x512xf32> to vector<4x128xf32>
    %359 = math.tanh %358 : vector<4x128xf32>
    %360 = vector.extract_strided_slice %341 {offsets = [0, 384], sizes = [4, 128], strides = [1, 1]} : vector<4x512xf32> to vector<4x128xf32>
    %cst_148 = arith.constant 5.000000e-01 : f32
    %361 = vector.broadcast %cst_148 : f32 to vector<4x128xf32>
    %362 = arith.mulf %361, %360 : vector<4x128xf32>
    %363 = math.tanh %362 : vector<4x128xf32>
    %cst_149 = arith.constant 5.000000e-01 : f32
    %364 = vector.broadcast %cst_149 : f32 to vector<4x128xf32>
    %365 = arith.mulf %364, %363 : vector<4x128xf32>
    %cst_150 = arith.constant 5.000000e-01 : f32
    %366 = vector.broadcast %cst_150 : f32 to vector<4x128xf32>
    %367 = arith.addf %365, %366 : vector<4x128xf32>
    %368 = arith.mulf %357, %333 : vector<4x128xf32>
    %369 = arith.mulf %349, %359 : vector<4x128xf32>
    %370 = arith.addf %368, %369 : vector<4x128xf32>
    %371 = math.tanh %370 : vector<4x128xf32>
    %372 = arith.mulf %367, %371 : vector<4x128xf32>
    %c8_i32 = arith.constant 8 : i32
    %c0_151 = arith.constant 0 : index
    %c0_152 = arith.constant 0 : index
    %373 = vector.load %arg5[%c0_151, %c0_152] : memref<128x128xbf16, #tpu.memory_space<vmem>>, vector<128x128xbf16>
    %c0_153 = arith.constant 0 : index
    %c0_154 = arith.constant 0 : index
    %374 = vector.load %arg7[%c0_153, %c0_154] : memref<128x128xbf16, #tpu.memory_space<vmem>>, vector<128x128xbf16>
    %375 = arith.truncf %372 : vector<4x128xf32> to vector<4x128xbf16>
    %cst_155 = arith.constant dense<0.000000e+00> : vector<4x128xf32>
    %376 = tpu.matmul %375, %373, %cst_155 {dimension_numbers = #tpu.dot_dimension_numbers<[1], [0], [0], [1], [0, 0, 1, 1], [], []>} : vector<4x128xbf16>, vector<128x128xbf16>, vector<4x128xf32> -> vector<4x128xf32>
    %c0_156 = arith.constant 0 : index
    %c0_157 = arith.constant 0 : index
    %377 = vector.load %arg6[%c0_156, %c0_157] : memref<1x128xf32, #tpu.memory_space<vmem>>, vector<1x128xf32>
    %378 = vector.broadcast %377 : vector<1x128xf32> to vector<4x128xf32>
    %379 = arith.addf %376, %378 : vector<4x128xf32>
    %cst_158 = arith.constant 0.000000e+00 : f32
    %380 = vector.broadcast %cst_158 : f32 to vector<4x128xf32>
    %381 = arith.maximumf %379, %380 : vector<4x128xf32>
    %382 = arith.truncf %381 : vector<4x128xf32> to vector<4x128xbf16>
    %cst_159 = arith.constant dense<0.000000e+00> : vector<4x128xf32>
    %383 = tpu.matmul %382, %374, %cst_159 {dimension_numbers = #tpu.dot_dimension_numbers<[1], [0], [0], [1], [0, 0, 1, 1], [], []>} : vector<4x128xbf16>, vector<128x128xbf16>, vector<4x128xf32> -> vector<4x128xf32>
    %c0_160 = arith.constant 0 : index
    %c0_161 = arith.constant 0 : index
    %384 = vector.load %arg8[%c0_160, %c0_161] : memref<1x128xf32, #tpu.memory_space<vmem>>, vector<1x128xf32>
    %385 = vector.broadcast %384 : vector<1x128xf32> to vector<4x128xf32>
    %386 = arith.addf %383, %385 : vector<4x128xf32>
    %c7_162 = arith.constant 7 : index
    %c0_163 = arith.constant 0 : index
    %c0_164 = arith.constant 0 : index
    %387 = vector.load %arg1[%c7_162, %c0_163, %c0_164] : memref<8x4x6xf32, #tpu.memory_space<vmem>>, vector<1x4x6xf32>
    %388 = vector.shape_cast %387 : vector<1x4x6xf32> to vector<4x6xf32>
    %c0_165 = arith.constant 0 : index
    %c0_166 = arith.constant 0 : index
    %389 = vector.load %arg9[%c0_165, %c0_166] : memref<128x128xf32, #tpu.memory_space<vmem>>, vector<128x128xf32>
    %cst_167 = arith.constant dense<0.000000e+00> : vector<4x128xf32>
    %390 = tpu.matmul %386, %389, %cst_167 {dimension_numbers = #tpu.dot_dimension_numbers<[1], [0], [0], [1], [0, 0, 1, 1], [], []>} : vector<4x128xf32>, vector<128x128xf32>, vector<4x128xf32> -> vector<4x128xf32>
    %c0_168 = arith.constant 0 : index
    %c0_169 = arith.constant 0 : index
    %391 = vector.load %arg10[%c0_168, %c0_169] : memref<6x128xf32, #tpu.memory_space<vmem>>, vector<6x128xf32>
    %cst_170 = arith.constant dense<0.000000e+00> : vector<4x128xf32>
    %392 = tpu.matmul %388, %391, %cst_170 {dimension_numbers = #tpu.dot_dimension_numbers<[1], [0], [0], [1], [0, 0, 1, 1], [], []>} : vector<4x6xf32>, vector<6x128xf32>, vector<4x128xf32> -> vector<4x128xf32>
    %393 = arith.addf %390, %392 : vector<4x128xf32>
    %c0_171 = arith.constant 0 : index
    %c0_172 = arith.constant 0 : index
    %394 = vector.load %arg11[%c0_171, %c0_172] : memref<4x128xf32, #tpu.memory_space<vmem>>, vector<4x128xf32>
    tpu.vector_store %arg11[%c0_171, %c0_172], %393 {strides = array<i32>} : memref<4x128xf32, #tpu.memory_space<vmem>>, vector<4x128xf32>,
    return
  }
  func.func @transform_0(%arg0: i32) -> (i32, i32, i32) {
    %c0_i32 = arith.constant 0 : i32
    %c0_i32_0 = arith.constant 0 : i32
    %c0_i32_1 = arith.constant 0 : i32
    return %c0_i32, %arg0, %c0_i32_0 : i32, i32, i32
  }
  func.func @transform_1(%arg0: i32) -> (i32, i32) {
    %c0_i32 = arith.constant 0 : i32
    %c0_i32_0 = arith.constant 0 : i32
    %c0_i32_1 = arith.constant 0 : i32
    return %c0_i32, %c0_i32_0 : i32, i32
  }
  func.func @transform_2(%arg0: i32) -> (i32, i32) {
    %c0_i32 = arith.constant 0 : i32
    %c0_i32_0 = arith.constant 0 : i32
    %c0_i32_1 = arith.constant 0 : i32
    return %c0_i32, %c0_i32_0 : i32, i32
  }
  func.func @transform_3(%arg0: i32) -> (i32, i32) {
    %c0_i32 = arith.constant 0 : i32
    %c0_i32_0 = arith.constant 0 : i32
    %c0_i32_1 = arith.constant 0 : i32
    return %c0_i32, %c0_i32_0 : i32, i32
  }
  func.func @transform_4(%arg0: i32) -> (i32, i32) {
    %c0_i32 = arith.constant 0 : i32
    %c0_i32_0 = arith.constant 0 : i32
    %c0_i32_1 = arith.constant 0 : i32
    return %c0_i32, %c0_i32_0 : i32, i32
  }
  func.func @transform_5(%arg0: i32) -> (i32, i32) {
    %c0_i32 = arith.constant 0 : i32
    %c0_i32_0 = arith.constant 0 : i32
    %c0_i32_1 = arith.constant 0 : i32
    return %c0_i32, %c0_i32_0 : i32, i32
  }
  func.func @transform_6(%arg0: i32) -> (i32, i32) {
    %c0_i32 = arith.constant 0 : i32
    %c0_i32_0 = arith.constant 0 : i32
    %c0_i32_1 = arith.constant 0 : i32
    return %c0_i32, %c0_i32_0 : i32, i32
  }
  func.func @transform_7(%arg0: i32) -> (i32, i32) {
    %c0_i32 = arith.constant 0 : i32
    %c0_i32_0 = arith.constant 0 : i32
    %c0_i32_1 = arith.constant 0 : i32
    return %c0_i32, %c0_i32_0 : i32, i32
  }
  func.func @transform_8(%arg0: i32) -> (i32, i32) {
    %c0_i32 = arith.constant 0 : i32
    %c0_i32_0 = arith.constant 0 : i32
    %c0_i32_1 = arith.constant 0 : i32
    return %c0_i32, %c0_i32_0 : i32, i32
  }
  func.func @transform_9(%arg0: i32) -> (i32, i32) {
    %c0_i32 = arith.constant 0 : i32
    %c0_i32_0 = arith.constant 0 : i32
    %c0_i32_1 = arith.constant 0 : i32
    return %c0_i32, %c0_i32_0 : i32, i32
  }
  func.func @transform_10(%arg0: i32) -> (i32, i32) {
    %c0_i32 = arith.constant 0 : i32
    %c0_i32_0 = arith.constant 0 : i32
    return %arg0, %c0_i32 : i32, i32
  }
}

</mosaic_0001>

<bundles_post_ra>
// kernel: tpu_custom_call.1
= control target key start
LH: loop header
LB: loop body
LE: loop exit
PB: predicated region body
PF: predicated region fallthrough
CT: control target
= control target key end

     0   :  { %15 = vsyncpa [#allocation4], 0  ;;  %s3980_s0 = inlined_call_operand.vmem [shape: f32[8,4,6], index: 0, kind: input, shape index: {}]   ;;  %s3981_s1 = inlined_call_operand.hbm [shape: bf16[6,512], index: 1, kind: input, shape index: {}]   ;;  %s3982_s2 = inlined_call_operand.hbm [shape: bf16[128,512], index: 2, kind: input, shape index: {}]   ;;  %s3983_s3 = inlined_call_operand.hbm [shape: f32[1,512], index: 3, kind: input, shape index: {}]   ;;  %s3984_s4 = inlined_call_operand.hbm [shape: bf16[128,128], index: 4, kind: input, shape index: {}]   ;;  %s3985_s5 = inlined_call_operand.hbm [shape: f32[1,128], index: 5, kind: input, shape index: {}]   ;;  %s3986_s6 = inlined_call_operand.vmem [shape: bf16[128,128], index: 6, kind: input, shape index: {}]   ;;  %s3987_s7 = inlined_call_operand.hbm [shape: f32[1,128], index: 7, kind: input, shape index: {}]   ;;  %s3988_s8 = inlined_call_operand.hbm [shape: f32[128,128], index: 8, kind: input, shape index: {}]   ;;  %s3989_s9 = inlined_call_operand.vmem [shape: f32[6,128], index: 9, kind: input, shape index: {}]   ;;  %s3990_s10 = inlined_call_operand.hbm [shape: f32[4,128], index: 10, kind: output, shape index: {}]  }
   0x1   :  { %16 = vsyncpa [#allocation7], 0 }
   0x2   :  { %17 = vsyncpa [#allocation10], 0 }
   0x3   :  { %18 = vsyncpa [#allocation13], 0 }
   0x4   :  { %19 = vsyncpa [#allocation5], 0  ;;  %s3094_s13 = smov [#allocation6]  }
   0x5   :  { %s37_s14 = sshll.u32 %s3094_s13, 4  ;;  %s38_s14 = int_to_ptr.vmem [resolvable:$true] %s37_s14 }
   0x6   :  { %s2932_s15 = scalar_lea.vmem %s38_s14, 4096  ;;  %p2937_p1 = scmp.lt.s32.totalorder %s38_s14, %s38_s14 }
   0x7   :  { %p2933_p0 = scmp.ne.s32.totalorder %s38_s14, %s2932_s15  ;;  %p2938_p2 = scmp.lt.s32.totalorder %s2932_s15, %s2932_s15 }
   0x9   :  { %p2939_p3 = por %p2938_p2, %p2937_p1 }
   0xb   :  { %p2940_p4 = pnand %p2939_p3, %p2933_p0 }
   0xd   :  { %2943 = shalt.err (!%p2940_p4)
}
   0xe   :  { %s3095_s16 = smov 256   ;;  %s3096_s17 = smov 16  }
   0xf   :  { %43 = dma.hbm_to_vmem [thread:$0]  %s3982_s2, 4096, %s38_s14, [#allocation7], %s3095_s16, %s3095_s16, %s3096_s17  }
  0x10   :  { %s3097_s20 = smov [#allocation9]  }
  0x11   :  { %s59_s21 = sshll.u32 %s3097_s20, 4  ;;  %s60_s21 = int_to_ptr.vmem [resolvable:$true] %s59_s21 }
  0x12   :  { %s2952_s22 = scalar_lea.vmem %s60_s21, 1024  ;;  %p2957_p6 = scmp.lt.s32.totalorder %s60_s21, %s60_s21 }
  0x13   :  { %p2953_p5 = scmp.ne.s32.totalorder %s60_s21, %s2952_s22  ;;  %p2958_p7 = scmp.lt.s32.totalorder %s2952_s22, %s2952_s22 }
  0x15   :  { %p2959_p8 = por %p2958_p7, %p2957_p6 }
  0x17   :  { %p2960_p9 = pnand %p2959_p8, %p2953_p5 }
  0x19   :  { %2963 = shalt.err (!%p2960_p9)
}
  0x1a   :  { %s3098_s23 = smov 64   ;;  %s3099_s24 = smov 4  }
  0x1b   :  { %65 = dma.hbm_to_vmem [thread:$0]  %s3984_s4, 1024, %s60_s21, [#allocation10], %s3098_s23, %s3098_s23, %s3099_s24  }
  0x1c   :  { %s3100_s27 = smov [#allocation12]   ;;  %s3101_s29 = smov [#allocation3]  }
  0x1d   :  { %s84_s28 = sshll.u32 %s3100_s27, 4  ;;  %s28_s2 = sshll.u32 %s3101_s29, 4  ;;  %s85_s28 = int_to_ptr.vmem [resolvable:$true] %s84_s28  ;;  %s29_s2 = int_to_ptr.vmem [resolvable:$true] %s28_s2 }
  0x1e   :  { %s2972_s30 = scalar_lea.vmem %s85_s28, 16  ;;  %s2976_s11 = scalar_lea.vmem %s85_s28, 32 }
  0x1f   :  { %p2973_p10 = scmp.ne.s32.totalorder %s85_s28, %s2972_s30  ;;  %p2977_p11 = scmp.lt.s32.totalorder %s85_s28, %s85_s28 }
  0x20   :  { %p2978_p12 = scmp.lt.s32.totalorder %s2976_s11, %s2972_s30 }
  0x22   :  { %p2979_p13 = por %p2978_p12, %p2977_p11 }
  0x24   :  { %p2980_p0 = pnand %p2979_p13, %p2973_p10 }
  0x26   :  { %2983 = shalt.err (!%p2980_p0)
}
  0x27   :  { %87 = dma.hbm_to_vmem [thread:$0]  %s3987_s7, 16, %s85_s28, [#allocation13]  }
  0x28   :  { %s2992_s14 = scalar_lea.vmem %s29_s2, 256  ;;  %p2997_p2 = scmp.lt.s32.totalorder %s29_s2, %s29_s2 }
  0x29   :  { %p2993_p1 = scmp.ne.s32.totalorder %s29_s2, %s2992_s14  ;;  %p2998_p3 = scmp.lt.s32.totalorder %s2992_s14, %s2992_s14 }
  0x2b   :  { %p2999_p4 = por %p2998_p3, %p2997_p2 }
  0x2d   :  { %p3000_p5 = pnand %p2999_p4, %p2993_p1 }
  0x2f   :  { %3003 = shalt.err (!%p3000_p5)
}
  0x30   :  { %31 = dma.hbm_to_vmem [thread:$0]  %s3981_s1, 256, %s29_s2, [#allocation4]  }
  0x31   :  { %s3102_s16 = smov [#allocation8]   ;;  %s3103_s18 = smov [#allocation11]  }
  0x32   :  { %s50_s17 = sshll.u32 %s3102_s16, 4  ;;  %s72_s19 = sshll.u32 %s3103_s18, 4  ;;  %s51_s17 = int_to_ptr.vmem [resolvable:$true] %s50_s17  ;;  %s73_s19 = int_to_ptr.vmem [resolvable:$true] %s72_s19 }
  0x33   :  { %s3012_s20 = scalar_lea.vmem %s51_s17, 64  ;;  %p3017_p7 = scmp.lt.s32.totalorder %s51_s17, %s51_s17 }
  0x34   :  { %p3013_p6 = scmp.ne.s32.totalorder %s51_s17, %s3012_s20  ;;  %p3018_p8 = scmp.lt.s32.totalorder %s3012_s20, %s3012_s20 }
  0x36   :  { %p3019_p9 = por %p3018_p8, %p3017_p7 }
  0x38   :  { %p3020_p10 = pnand %p3019_p9, %p3013_p6 }
  0x3a   :  { %3023 = shalt.err (!%p3020_p10)
}
  0x3b   :  { %53 = dma.hbm_to_vmem [thread:$0]  %s3983_s3, 64, %s51_s17, [#allocation7]  }
  0x3c   :  { %s3032_s22 = scalar_lea.vmem %s73_s19, 16  ;;  %s3036_s1 = scalar_lea.vmem %s73_s19, 32 }
  0x3d   :  { %p3033_p11 = scmp.ne.s32.totalorder %s73_s19, %s3032_s22  ;;  %p3037_p12 = scmp.lt.s32.totalorder %s73_s19, %s73_s19 }
  0x3e   :  { %p3038_p13 = scmp.lt.s32.totalorder %s3036_s1, %s3032_s22 }
  0x40   :  { %p3039_p0 = por %p3038_p13, %p3037_p12 }
  0x42   :  { %p3040_p1 = pnand %p3039_p0, %p3033_p11 }
  0x44   :  { %3043 = shalt.err (!%p3040_p1)
}
  0x45   :  { %75 = dma.hbm_to_vmem [thread:$0]  %s3985_s5, 16, %s73_s19, [#allocation10]  }
  0x46   :  { %s3104_s25 = smov [#allocation14]  }
  0x47   :  { %s93_s26 = sshll.u32 %s3104_s25, 4  ;;  %s94_s26 = int_to_ptr.vmem [resolvable:$true] %s93_s26 }
  0x48   :  { %s3052_s27 = scalar_lea.vmem %s94_s26, 2048  ;;  %p3057_p3 = scmp.lt.s32.totalorder %s94_s26, %s94_s26 }
  0x49   :  { %p3053_p2 = scmp.ne.s32.totalorder %s94_s26, %s3052_s27  ;;  %p3058_p4 = scmp.lt.s32.totalorder %s3052_s27, %s3052_s27 }
  0x4b   :  { %p3059_p5 = por %p3058_p4, %p3057_p3 }
  0x4d   :  { %p3060_p6 = pnand %p3059_p5, %p3053_p2 }
  0x4f   :  { %3063 = shalt.err (!%p3060_p6)
}
  0x50   :  { %s3105_s3 = smov 128   ;;  %s3106_s28 = smov 8  }
  0x51   :  { %99 = dma.hbm_to_vmem [thread:$0]  %s3988_s8, 2048, %s94_s26, [#allocation13], %s3105_s3, %s3105_s3, %s3106_s28  }
  0x52   :  { %3084 = dma.done.wait [#allocation4], 256  }
  0x53   :  { %3085 = vsyncadd [#allocation4], 4294967040 }
  0x54   :  { %3086 = dma.done.wait [#allocation7], 4160  }
  0x55   :  { %3087 = vsyncadd [#allocation7], 4294963136 }
  0x56   :  { %3088 = dma.done.wait [#allocation10], 1040  }
  0x57   :  { %3089 = vsyncadd [#allocation10], 4294966256 }
  0x58   :  { %3090 = dma.done.wait [#allocation13], 2064  }
  0x59   :  { %3091 = vsyncadd [#allocation13], 4294965232  ;;  %v3991_v0 = vmov 0   ;;  %vm196_vm0 = vcmask 1042432   ;;  %v124_v1 = vld [vmem:[#allocation3] sm:$0x77]  ;;  %v162_v57 = vlaneseq }
  0x5a   :  { %241 = vmatprep.mubr.bf16.mxu0 %v3991_v0  ;;  %380 = vmatprep.mubr.bf16.mxu1 %v3991_v0  ;;  %v125_v2 = vld [vmem:[#allocation3 + $0x8] sm:$0x77]  ;;  %v159_v3 = vld [vmem:[%s3980_s0] sm:$0xf]  ;;  %v3192_v4 = vcombine.high %v124_v1, %v124_v1  ;;  %v2514_v6 = vcombine.low %v124_v1, %v124_v1  ;;  %v2522_v8 = vld [vmem:[%s3980_s0 + $0x4] sm:$0xf] }
  0x5b   :  { %v3194_v5 = vcombine.high %v125_v2, %v125_v2  ;;  %v2516_v7 = vcombine.low %v125_v2, %v125_v2  ;;  %v160_v11 = vpack.c.bf16 %v159_v3, %v159_v3  ;;  %v303_v12 = vpack.c.bf16 %v2522_v8, %v2522_v8  ;;  %v2527_v13 = vld [vmem:[%s3980_s0 + $0x8] sm:$0xf]  ;;  %v2532_v15 = vld [vmem:[%s3980_s0 + $0xc] sm:$0xf]  ;;  %v2537_v17 = vld [vmem:[%s3980_s0 + $0x10] sm:$0xf] }
  0x5c   :  { %2518 = vmatprep.subr.msk.bf16.mxu0 %vm196_vm0, %v3192_v4  ;;  %v3204_v9 = vsel %vm196_vm0, %v2514_v6, 0  ;;  %vm192_vm1 = vcmask 48128   ;;  %v402_v14 = vpack.c.bf16 %v2527_v13, %v2527_v13  ;;  %v501_v16 = vpack.c.bf16 %v2532_v15, %v2532_v15  ;;  %v2542_v19 = vld [vmem:[%s3980_s0 + $0x14] sm:$0xf]  ;;  %v2547_v21 = vld [vmem:[%s3980_s0 + $0x18] sm:$0xf] }
  0x5d   :  { %2525 = vmatprep.subr.msk.bf16.mxu1 %vm196_vm0, %v3194_v5  ;;  %v204_v10 = vsel %vm196_vm0, %v2516_v7, 0  ;;  %224 = vmatpush1.bf16.msra.mxu0 %v3204_v9  ;;  %v600_v18 = vpack.c.bf16 %v2537_v17, %v2537_v17  ;;  %v699_v20 = vpack.c.bf16 %v2542_v19, %v2542_v19  ;;  %v798_v22 = vpack.c.bf16 %v2547_v21, %v2547_v21  ;;  %v3271_v23 = vld [vmem:[#allocation6 + $0xec] ss:$16 sps:$4 sm:$0xff]   ;;  %v3284_v26 = vld [vmem:[#allocation6 + $0xe8] ss:$16 sps:$4 sm:$0xff]   ;;  %s3110_s4 = smov [#allocation15]  }
  0x5e   :  { %363 = vmatpush1.bf16.msra.mxu1 %v204_v10  ;;  %2520 = vmatprep.subr.msk.bf16.mxu0 %vm196_vm0, %v3194_v5  ;;  %v2552_v24 = vld [vmem:[%s3980_s0 + $0x1c] sm:$0xf]  ;;  %v3292_v28 = vld [vmem:[#allocation6 + $0xc8] ss:$16 sps:$4 sm:$0xff]   ;;  %v3307_v32 = vld [vmem:[#allocation6 + $0xe4] ss:$16 sps:$4 sm:$0xff]  }
  0x5f   :  { %2530 = vmatprep.subr.msk.bf16.mxu1 %vm196_vm0, %v3194_v5  ;;  %v897_v25 = vpack.c.bf16 %v2552_v24, %v2552_v24  ;;  %v3286_v27 = vld [vmem:[#allocation6 + $0xcc] ss:$16 sps:$4 sm:$0xff]   ;;  %v3302_v30 = vld [vmem:[#allocation6 + $0xa8] ss:$16 sps:$4 sm:$0xff]   ;;  %v3320_v35 = vld [vmem:[#allocation6 + $0xe0] ss:$16 sps:$4 sm:$0xff]  }
  0x60   :  { %2519 = vmatmul.mubr.msk.bf16.vlgmr.msra.gmra.mxu0 %vm192_vm1, %v160_v11  ;;  %v3296_v29 = vld [vmem:[#allocation6 + $0xac] ss:$16 sps:$4 sm:$0xff]   ;;  %v3312_v33 = vld [vmem:[#allocation6 + $0x88] ss:$16 sps:$4 sm:$0xff]   ;;  %v3325_v37 = vld [vmem:[#allocation6 + $0xc4] ss:$16 sps:$4 sm:$0xff]  }
  0x61   :  { %2526 = vmatmul.mubr.msk.bf16.vlgmr.msra.gmra.mxu1 %vm192_vm1, %v303_v12  ;;  %265 = vmatpush1.bf16.msra.mxu0 %v204_v10  ;;  %v3305_v31 = vld [vmem:[#allocation6 + $0x8c] ss:$16 sps:$4 sm:$0xff]   ;;  %v3322_v36 = vld [vmem:[#allocation6 + $0x68] ss:$16 sps:$4 sm:$0xff]   ;;  %v3332_v39 = vld [vmem:[#allocation6 + $0xc0] ss:$16 sps:$4 sm:$0xff]  }
  0x62   :  { %462 = vmatpush1.bf16.msra.mxu1 %v204_v10  ;;  %282 = vmatprep.mubr.bf16.mxu0 %v3991_v0  ;;  %v3316_v34 = vld [vmem:[#allocation6 + $0x6c] ss:$16 sps:$4 sm:$0xff]   ;;  %v3334_v40 = vld [vmem:[#allocation6 + $0x48] ss:$16 sps:$4 sm:$0xff]   ;;  %v3338_v41 = vld [vmem:[#allocation6 + $0xa4] ss:$16 sps:$4 sm:$0xff]  }
  0x63   :  { %479 = vmatprep.mubr.bf16.mxu1 %v3991_v0  ;;  %2523 = vmatprep.subr.msk.bf16.mxu0 %vm196_vm0, %v3192_v4  ;;  %v3327_v38 = vld [vmem:[#allocation6 + $0x4c] ss:$16 sps:$4 sm:$0xff]   ;;  %v3345_v43 = vld [vmem:[#allocation6 + $0xa0] ss:$16 sps:$4 sm:$0xff]   ;;  %v3347_v44 = vld [vmem:[#allocation6 + $0x28] ss:$16 sps:$4 sm:$0xff]  }
  0x64   :  { %2535 = vmatprep.subr.msk.bf16.mxu1 %vm196_vm0, %v3194_v5  ;;  %v3340_v42 = vld [vmem:[#allocation6 + $0x2c] ss:$16 sps:$4 sm:$0xff]   ;;  %v3351_v45 = vld [vmem:[#allocation6 + $0x84] ss:$16 sps:$4 sm:$0xff]   ;;  %v3357_v47 = vld [vmem:[#allocation6 + $0x80] ss:$16 sps:$4 sm:$0xff]  }
  0x65   :  { %v3353_v46 = vld [vmem:[#allocation6 + $0xc] ss:$16 sps:$4 sm:$0xff]   ;;  %v3359_v48 = vld [vmem:[#allocation6 + $0x8] ss:$16 sps:$4 sm:$0xff]   ;;  %v3363_v49 = vld [vmem:[#allocation6 + $0x64] ss:$16 sps:$4 sm:$0xff]  }
  0x66   :  { %v3367_v50 = vld [vmem:[#allocation6 + $0x60] ss:$16 sps:$4 sm:$0xff]   ;;  %v3370_v51 = vld [vmem:[#allocation6 + $0x44] ss:$16 sps:$4 sm:$0xff]   ;;  %v163_v58 = vshrl.u32 %v162_v57, 7  ;;  %vm3109_vm2 = vmmov 0  }
  0x67   :  { %v3375_v52 = vld [vmem:[#allocation6 + $0x40] ss:$16 sps:$4 sm:$0xff]   ;;  %v3379_v53 = vld [vmem:[#allocation6 + $0x24] ss:$16 sps:$4 sm:$0xff]   ;;  %vm2351_vm3 = vcmask 1045504   ;;  %s2502_s15 = sshll.u32 %s3110_s4, 4  ;;  %s2503_s15 = int_to_ptr.vmem [resolvable:$true] %s2502_s15 }
  0x68   :  { %2521 = vmatmul.mubr.msk.bf16.vlgmr.msra.gmra.mxu0 %vm192_vm1, %v160_v11  ;;  %v3384_v54 = vld [vmem:[#allocation6 + $0x20] ss:$16 sps:$4 sm:$0xff]   ;;  %v3388_v55 = vld [vmem:[#allocation6 + $0x4] ss:$16 sps:$4 sm:$0xff]   ;;  %v164_v59 = vsub.s32 0, %v163_v58  ;;  %v168_v60 = vsub.s32 1, %v163_v58  ;;  %p3069_p8 = scmp.lt.s32.totalorder %s2503_s15, %s2503_s15 }
  0x69   :  { %2531 = vmatmul.mubr.msk.bf16.vlgmr.msra.gmra.mxu1 %vm192_vm1, %v402_v14  ;;  %322 = vmatpush1.bf16.msra.mxu0 %v3204_v9  ;;  %v3392_v56 = vld [vmem:[#allocation6] ss:$16 sps:$4 sm:$0xff]   ;;  %v172_v61 = vsub.s32 2, %v163_v58  ;;  %v176_v63 = vsub.s32 3, %v163_v58 }
  0x6a   :  { %561 = vmatpush1.bf16.msra.mxu1 %v204_v10  ;;  %339 = vmatprep.mubr.bf16.mxu0 %v3991_v0  ;;  %v158_v62 = vld [vmem:[#allocation8] sm:$0xf] }
  0x6b   :  { %578 = vmatprep.mubr.bf16.mxu1 %v3991_v0  ;;  %2528 = vmatprep.subr.msk.bf16.mxu0 %vm196_vm0, %v3192_v4  ;;  %v3427_v1 = vrot.slane %v158_v62, %v164_v59  ;;  %v3429_v2 = vrot.slane %v158_v62, %v168_v60  ;;  %v3431_v3 = vrot.slane %v158_v62, %v172_v61 }
  0x6c   :  { %2540 = vmatprep.subr.msk.bf16.mxu1 %vm196_vm0, %v3194_v5  ;;  %v3433_v6 = vrot.slane %v158_v62, %v176_v63 }
  0x70   :  { %2524 = vmatmul.mubr.msk.bf16.vlgmr.msra.gmra.mxu0 %vm192_vm1, %v303_v12 }
  0x71   :  { %2536 = vmatmul.mubr.msk.bf16.vlgmr.msra.gmra.mxu1 %vm192_vm1, %v501_v16  ;;  %421 = vmatpush1.bf16.msra.mxu0 %v3204_v9 }
  0x72   :  { %660 = vmatpush1.bf16.msra.mxu1 %v204_v10  ;;  %438 = vmatprep.mubr.bf16.mxu0 %v3991_v0 }
  0x73   :  { %677 = vmatprep.mubr.bf16.mxu1 %v3991_v0  ;;  %2533 = vmatprep.subr.msk.bf16.mxu0 %vm196_vm0, %v3192_v4 }
  0x74   :  { %2545 = vmatprep.subr.msk.bf16.mxu1 %vm196_vm0, %v3194_v5 }
  0x78   :  { %2529 = vmatmul.mubr.msk.bf16.vlgmr.msra.gmra.mxu0 %vm192_vm1, %v402_v14 }
  0x79   :  { %2541 = vmatmul.mubr.msk.bf16.vlgmr.msra.gmra.mxu1 %vm192_vm1, %v600_v18  ;;  %520 = vmatpush1.bf16.msra.mxu0 %v3204_v9 }
  0x7a   :  { %759 = vmatpush1.bf16.msra.mxu1 %v204_v10  ;;  %537 = vmatprep.mubr.bf16.mxu0 %v3991_v0 }
  0x7b   :  { %776 = vmatprep.mubr.bf16.mxu1 %v3991_v0  ;;  %2538 = vmatprep.subr.msk.bf16.mxu0 %vm196_vm0, %v3192_v4 }
  0x7c   :  { %2550 = vmatprep.subr.msk.bf16.mxu1 %vm196_vm0, %v3194_v5 }
  0x80   :  { %2534 = vmatmul.mubr.msk.bf16.vlgmr.msra.gmra.mxu0 %vm192_vm1, %v501_v16 }
  0x81   :  { %2546 = vmatmul.mubr.msk.bf16.vlgmr.msra.gmra.mxu1 %vm192_vm1, %v699_v20  ;;  %619 = vmatpush1.bf16.msra.mxu0 %v3204_v9 }
  0x82   :  { %858 = vmatpush1.bf16.msra.mxu1 %v204_v10  ;;  %636 = vmatprep.mubr.bf16.mxu0 %v3991_v0 }
  0x83   :  { %875 = vmatprep.mubr.bf16.mxu1 %v3991_v0  ;;  %2543 = vmatprep.subr.msk.bf16.mxu0 %vm196_vm0, %v3192_v4 }
  0x84   :  { %2555 = vmatprep.subr.msk.bf16.mxu1 %vm196_vm0, %v3194_v5 }
  0x88   :  { %2539 = vmatmul.mubr.msk.bf16.vlgmr.msra.gmra.mxu0 %vm192_vm1, %v600_v18 }
  0x89   :  { %2551 = vmatmul.mubr.msk.bf16.vlgmr.msra.gmra.mxu1 %vm192_vm1, %v798_v22  ;;  %718 = vmatpush1.bf16.msra.mxu0 %v3204_v9 }
  0x8a   :  { %957 = vmatpush1.bf16.msra.mxu1 %v204_v10  ;;  %735 = vmatprep.mubr.bf16.mxu0 %v3991_v0 }
  0x8b   :  { %974 = vmatprep.mubr.bf16.mxu1 %v3991_v0  ;;  %1197 = vmatprep.subr.bf16.mxu1 %v3271_v23 }
  0x8c   :  { %2548 = vmatprep.subr.msk.bf16.mxu0 %vm196_vm0, %v3192_v4 }
  0x90   :  { %2544 = vmatmul.mubr.msk.bf16.vlgmr.msra.gmra.mxu0 %vm192_vm1, %v699_v20 }
  0x91   :  { %2556 = vmatmul.mubr.msk.bf16.vlgmr.msra.gmra.mxu1 %vm192_vm1, %v897_v25  ;;  %817 = vmatpush1.bf16.msra.mxu0 %v3204_v9 }
  0x92   :  { %1198 = vmatpush1.bf16.msra.mxu1 %v3284_v26  ;;  %834 = vmatprep.mubr.bf16.mxu0 %v3991_v0 }
  0x93   :  { %1199 = vmatprep.subr.bf16.mxu1 %v3286_v27  ;;  %2553 = vmatprep.subr.msk.bf16.mxu0 %vm196_vm0, %v3192_v4 }
  0x94   :  { %1229 = vmatprep.mubr.bf16.mxu1 %v3991_v0 }
  0x96   :  { %1200 = vmatpush1.bf16.msra.mxu1 %v3292_v28 }
  0x97   :  { %1201 = vmatprep.subr.bf16.mxu1 %v3296_v29 }
  0x98   :  { %2549 = vmatmul.mubr.msk.bf16.vlgmr.msra.gmra.mxu0 %vm192_vm1, %v798_v22 }
  0x99   :  { %916 = vmatpush1.bf16.msra.mxu0 %v3204_v9  ;;  %933 = vmatprep.mubr.bf16.mxu0 %v3991_v0 }
  0x9a   :  { %1202 = vmatpush1.bf16.msra.mxu1 %v3302_v30  ;;  %1156 = vmatprep.subr.bf16.mxu0 %v3307_v32 }
  0x9b   :  { %1203 = vmatprep.subr.bf16.mxu1 %v3305_v31 }
  0x9e   :  { %1204 = vmatpush1.bf16.msra.mxu1 %v3312_v33 }
  0x9f   :  { %1205 = vmatprep.subr.bf16.mxu1 %v3316_v34 }
  0xa0   :  { %2554 = vmatmul.mubr.msk.bf16.vlgmr.msra.gmra.mxu0 %vm192_vm1, %v897_v25 }
  0xa1   :  { %1157 = vmatpush1.bf16.msra.mxu0 %v3320_v35  ;;  %1188 = vmatprep.mubr.bf16.mxu0 %v3991_v0 }
  0xa2   :  { %1206 = vmatpush1.bf16.msra.mxu1 %v3322_v36  ;;  %1158 = vmatprep.subr.bf16.mxu0 %v3325_v37 }
  0xa3   :  { %1207 = vmatprep.subr.bf16.mxu1 %v3327_v38 }
  0xa5   :  { %1159 = vmatpush1.bf16.msra.mxu0 %v3332_v39 }
  0xa6   :  { %1208 = vmatpush1.bf16.msra.mxu1 %v3334_v40  ;;  %1160 = vmatprep.subr.bf16.mxu0 %v3338_v41 }
  0xa7   :  { %1209 = vmatprep.subr.bf16.mxu1 %v3340_v42 }
  0xa9   :  { %1161 = vmatpush1.bf16.msra.mxu0 %v3345_v43 }
  0xaa   :  { %1210 = vmatpush1.bf16.msra.mxu1 %v3347_v44  ;;  %1162 = vmatprep.subr.bf16.mxu0 %v3351_v45 }
  0xab   :  { %1211 = vmatprep.subr.bf16.mxu1 %v3353_v46 }
  0xad   :  { %1163 = vmatpush1.bf16.msra.mxu0 %v3357_v47 }
  0xae   :  { %1212 = vmatpush1.bf16.msra.mxu1 %v3359_v48  ;;  %1164 = vmatprep.subr.bf16.mxu0 %v3363_v49 }
  0xaf   :  { %1316 = vmatprep.subr.bf16.mxu1 %v3271_v23 }
  0xb1   :  { %1230 = vmatmul.mubr.bf16.vlgmr.msra.gmra.mxu1 %v3991_v0  ;;  %1165 = vmatpush1.bf16.msra.mxu0 %v3367_v50 }
  0xb2   :  { %1317 = vmatpush1.bf16.msra.mxu1 %v3284_v26  ;;  %1166 = vmatprep.subr.bf16.mxu0 %v3370_v51 }
  0xb3   :  { %1318 = vmatprep.subr.bf16.mxu1 %v3286_v27  ;;  %1348 = vmatprep.mubr.bf16.mxu1 %v3991_v0 }
  0xb5   :  { %1167 = vmatpush1.bf16.msra.mxu0 %v3375_v52 }
  0xb6   :  { %1319 = vmatpush1.bf16.msra.mxu1 %v3292_v28  ;;  %1168 = vmatprep.subr.bf16.mxu0 %v3379_v53 }
  0xb7   :  { %1320 = vmatprep.subr.bf16.mxu1 %v3296_v29 }
  0xb9   :  { %1169 = vmatpush1.bf16.msra.mxu0 %v3384_v54 }
  0xba   :  { %1321 = vmatpush1.bf16.msra.mxu1 %v3302_v30  ;;  %1170 = vmatprep.subr.bf16.mxu0 %v3388_v55 }
  0xbb   :  { %1322 = vmatprep.subr.bf16.mxu1 %v3305_v31 }
  0xbd   :  { %1171 = vmatpush1.bf16.msra.mxu0 %v3392_v56 }
  0xbe   :  { %1323 = vmatpush1.bf16.msra.mxu1 %v3312_v33  ;;  %1275 = vmatprep.subr.bf16.mxu0 %v3307_v32 }
  0xbf   :  { %1324 = vmatprep.subr.bf16.mxu1 %v3316_v34 }
  0xc0   :  { %1189 = vmatmul.mubr.bf16.vlgmr.msra.gmra.mxu0 %v3991_v0 }
  0xc1   :  { %1276 = vmatpush1.bf16.msra.mxu0 %v3320_v35  ;;  %1307 = vmatprep.mubr.bf16.mxu0 %v3991_v0 }
  0xc2   :  { %1325 = vmatpush1.bf16.msra.mxu1 %v3322_v36  ;;  %1277 = vmatprep.subr.bf16.mxu0 %v3325_v37 }
  0xc3   :  { %1326 = vmatprep.subr.bf16.mxu1 %v3327_v38 }
  0xc5   :  { %1278 = vmatpush1.bf16.msra.mxu0 %v3332_v39 }
  0xc6   :  { %1327 = vmatpush1.bf16.msra.mxu1 %v3334_v40  ;;  %1279 = vmatprep.subr.bf16.mxu0 %v3338_v41 }
  0xc7   :  { %1328 = vmatprep.subr.bf16.mxu1 %v3340_v42 }
  0xc9   :  { %1280 = vmatpush1.bf16.msra.mxu0 %v3345_v43 }
  0xca   :  { %1329 = vmatpush1.bf16.msra.mxu1 %v3347_v44  ;;  %1281 = vmatprep.subr.bf16.mxu0 %v3351_v45 }
  0xcb   :  { %1330 = vmatprep.subr.bf16.mxu1 %v3353_v46 }
  0xcd   :  { %1282 = vmatpush1.bf16.msra.mxu0 %v3357_v47 }
  0xce   :  { %1331 = vmatpush1.bf16.msra.mxu1 %v3359_v48  ;;  %1283 = vmatprep.subr.bf16.mxu0 %v3363_v49 }
  0xcf   :  { %1435 = vmatprep.subr.bf16.mxu1 %v3271_v23 }
  0xd1   :  { %1284 = vmatpush1.bf16.msra.mxu0 %v3367_v50 }
  0xd2   :  { %1285 = vmatprep.subr.bf16.mxu0 %v3370_v51 }
  0xd5   :  { %1286 = vmatpush1.bf16.msra.mxu0 %v3375_v52 }
  0xd6   :  { %1287 = vmatprep.subr.bf16.mxu0 %v3379_v53 }
  0xd9   :  { %1288 = vmatpush1.bf16.msra.mxu0 %v3384_v54 }
  0xda   :  { %1289 = vmatprep.subr.bf16.mxu0 %v3388_v55 }
  0xdd   :  { %1290 = vmatpush1.bf16.msra.mxu0 %v3392_v56 }
  0xde   :  { %1394 = vmatprep.subr.bf16.mxu0 %v3307_v32 }
 0x120   :  { %v243_v4 = vpop.f32.mrf.mxu0 }
 0x121   :  { %v382_v5 = vpop.f32.mrf.mxu1  ;;  %v3439_v10 = vadd.f32 %v243_v4, %v3427_v1 }
 0x122   :  { %v3436_v7 = vadd.f32 %v382_v5, %v3431_v3  ;;  %v245_v8 = vpop.f32.mrf.mxu0 }
 0x123   :  { %v384_v9 = vpop.f32.mrf.mxu1  ;;  %v3442_v11 = vadd.f32 %v245_v8, %v3429_v2 }
 0x124   :  { %v3445_v12 = vadd.f32 %v384_v9, %v3433_v6  ;;  %v247_v13 = vpop.f32.mrf.mxu0 }
 0x125   :  { %v386_v14 = vpop.f32.mrf.mxu1 }
 0x126   :  { %v248_v17 = vpop.f32.mrf.mxu0 }
 0x127   :  { %v387_v18 = vpop.f32.mrf.mxu1 }
 0x128   :  { %v284_v19 = vpop.f32.mrf.mxu0 }
 0x129   :  { %v481_v20 = vpop.f32.mrf.mxu1  ;;  %v3455_v25 = vadd.f32 %v284_v19, %v3431_v3 }
 0x12a   :  { %v3452_v21 = vadd.f32 %v481_v20, %v3431_v3  ;;  %v286_v22 = vpop.f32.mrf.mxu0 }
 0x12b   :  { %v483_v24 = vpop.f32.mrf.mxu1  ;;  %v3458_v57 = vadd.f32 %v286_v22, %v3433_v6 }
 0x12c   :  { %v3461_v58 = vadd.f32 %v483_v24, %v3433_v6  ;;  %v288_v59 = vpop.f32.mrf.mxu0 }
 0x12d   :  { %v485_v60 = vpop.f32.mrf.mxu1 }
 0x12e   :  { %v289_v63 = vpop.f32.mrf.mxu0 }
 0x12f   :  { %v486_v4 = vpop.f32.mrf.mxu1 }
 0x130   :  { %v341_v5 = vpop.f32.mrf.mxu0 }
 0x131   :  { %v580_v8 = vpop.f32.mrf.mxu1  ;;  %v3468_v9 = vadd.f32 %v341_v5, %v3427_v1 }
 0x132   :  { %v3471_v13 = vadd.f32 %v580_v8, %v3431_v3  ;;  %v343_v14 = vpop.f32.mrf.mxu0 }
 0x133   :  { %v582_v17 = vpop.f32.mrf.mxu1  ;;  %v3474_v18 = vadd.f32 %v343_v14, %v3429_v2 }
 0x134   :  { %4010 = vst [vmem:[#allocation21_spill] sm:$0xff] %v3471_v13  ;;  %v3477_v19 = vadd.f32 %v582_v17, %v3433_v6  ;;  %v345_v20 = vpop.f32.mrf.mxu0 }
 0x135   :  { %v584_v22 = vpop.f32.mrf.mxu1 }
 0x136   :  { %4011 = vst [vmem:[#allocation22_spill] sm:$0xff] %v3477_v19  ;;  %v346_v60 = vpop.f32.mrf.mxu0 }
 0x137   :  { %v585_v63 = vpop.f32.mrf.mxu1 }
 0x138   :  { %v440_v4 = vpop.f32.mrf.mxu0 }
 0x139   :  { %v679_v5 = vpop.f32.mrf.mxu1  ;;  %v3484_v8 = vadd.f32 %v440_v4, %v3427_v1 }
 0x13a   :  { %v3487_v14 = vadd.f32 %v679_v5, %v3431_v3  ;;  %v442_v17 = vpop.f32.mrf.mxu0 }
 0x13b   :  { %v681_v62 = vpop.f32.mrf.mxu1  ;;  %v3490_v20 = vadd.f32 %v442_v17, %v3429_v2 }
 0x13c   :  { %4012 = vst [vmem:[#allocation23_spill] sm:$0xff] %v3487_v14  ;;  %v3493_v22 = vadd.f32 %v681_v62, %v3433_v6  ;;  %v444_v16 = vpop.f32.mrf.mxu0 }
 0x13d   :  { %v683_v59 = vpop.f32.mrf.mxu1 }
 0x13e   :  { %4013 = vst [vmem:[#allocation24_spill] sm:$0xff] %v3493_v22  ;;  %v445_v4 = vpop.f32.mrf.mxu0 }
 0x13f   :  { %v684_v24 = vpop.f32.mrf.mxu1 }
 0x140   :  { %v539_v5 = vpop.f32.mrf.mxu0 }
 0x141   :  { %v778_v0 = vpop.f32.mrf.mxu1  ;;  %v3500_v61 = vadd.f32 %v539_v5, %v3427_v1 }
 0x142   :  { %v3503_v17 = vadd.f32 %v778_v0, %v3431_v3  ;;  %v541_v62 = vpop.f32.mrf.mxu0 }
 0x143   :  { %4014 = vst [vmem:[#allocation25_spill] sm:$0xff] %v3500_v61  ;;  %v780_v15 = vpop.f32.mrf.mxu1  ;;  %v3506_v16 = vadd.f32 %v541_v62, %v3429_v2 }
 0x144   :  { %4015 = vst [vmem:[#allocation26_spill] sm:$0xff] %v3503_v17  ;;  %v3509_v59 = vadd.f32 %v780_v15, %v3433_v6  ;;  %v543_v60 = vpop.f32.mrf.mxu0 }
 0x145   :  { %4016 = vst [vmem:[#allocation27_spill] sm:$0xff] %v3506_v16  ;;  %v782_v63 = vpop.f32.mrf.mxu1 }
 0x146   :  { %4017 = vst [vmem:[#allocation28_spill] sm:$0xff] %v3509_v59  ;;  %v544_v5 = vpop.f32.mrf.mxu0 }
 0x147   :  { %v783_v22 = vpop.f32.mrf.mxu1 }
 0x148   :  { %v638_v0 = vpop.f32.mrf.mxu0 }
 0x149   :  { %v877_v14 = vpop.f32.mrf.mxu1  ;;  %v3516_v19 = vadd.f32 %v638_v0, %v3427_v1 }
 0x14a   :  { %v3519_v62 = vadd.f32 %v877_v14, %v3431_v3  ;;  %v640_v15 = vpop.f32.mrf.mxu0 }
 0x14b   :  { %v879_v13 = vpop.f32.mrf.mxu1  ;;  %v3522_v60 = vadd.f32 %v640_v15, %v3429_v2 }
 0x14c   :  { %4018 = vst [vmem:[#allocation29_spill] sm:$0xff] %v3519_v62  ;;  %v3525_v63 = vadd.f32 %v879_v13, %v3433_v6  ;;  %v642_v24 = vpop.f32.mrf.mxu0 }
 0x14d   :  { %v881_v4 = vpop.f32.mrf.mxu1 }
 0x14e   :  { %4019 = vst [vmem:[#allocation30_spill] sm:$0xff] %v3525_v63  ;;  %v643_v0 = vpop.f32.mrf.mxu0 }
 0x14f   :  { %v882_v59 = vpop.f32.mrf.mxu1 }
 0x150   :  { %v737_v14 = vpop.f32.mrf.mxu0 }
 0x151   :  { %v976_v17 = vpop.f32.mrf.mxu1  ;;  %v3532_v16 = vadd.f32 %v737_v14, %v3427_v1 }
 0x152   :  { %v3535_v15 = vadd.f32 %v976_v17, %v3431_v3  ;;  %v739_v13 = vpop.f32.mrf.mxu0 }
 0x153   :  { %4020 = vst [vmem:[#allocation31_spill] sm:$0xff] %v3532_v16  ;;  %v978_v61 = vpop.f32.mrf.mxu1  ;;  %v3538_v24 = vadd.f32 %v739_v13, %v3429_v2 }
 0x154   :  { %4021 = vst [vmem:[#allocation32_spill] sm:$0xff] %v3535_v15  ;;  %v3541_v4 = vadd.f32 %v978_v61, %v3433_v6  ;;  %v741_v22 = vpop.f32.mrf.mxu0 }
 0x155   :  { %4022 = vst [vmem:[#allocation33_spill] sm:$0xff] %v3538_v24  ;;  %v980_v5 = vpop.f32.mrf.mxu1 }
 0x156   :  { %4023 = vst [vmem:[#allocation34_spill] sm:$0xff] %v3541_v4  ;;  %v742_v14 = vpop.f32.mrf.mxu0 }
 0x157   :  { %v981_v63 = vpop.f32.mrf.mxu1 }
 0x158   :  { %v836_v3 = vpop.f32.mrf.mxu0 }
 0x159   :  { %v3548_v17 = vadd.f32 %v836_v3, %v3427_v1  ;;  %v4028_v3 = vcombine.low %v3455_v25, %v3458_v57 }
 0x15a   :  { %v838_v62 = vpop.f32.mrf.mxu0 }
 0x15b   :  { %4024 = vst [vmem:[#allocation35_spill] sm:$0xff] %v3548_v17  ;;  %v3551_v13 = vadd.f32 %v838_v62, %v3429_v2 }
 0x15c   :  { %v840_v6 = vpop.f32.mrf.mxu0 }
 0x15d   :  { %4025 = vst [vmem:[#allocation36_spill] sm:$0xff] %v3551_v13 }
 0x15e   :  { %v841_v22 = vpop.f32.mrf.mxu0 }
 0x160   :  { %v935_v5 = vpop.f32.mrf.mxu0 }
 0x161   :  { %v3556_v59 = vadd.f32 %v935_v5, %v3427_v1  ;;  %v4027_v1 = vcombine.low %v3439_v10, %v3442_v11 }
 0x162   :  { %v937_v0 = vpop.f32.mrf.mxu0 }
 0x163   :  { %v3559_v63 = vadd.f32 %v937_v0, %v3429_v2 }
 0x164   :  { %v939_v14 = vpop.f32.mrf.mxu0 }
 0x165   :  { %4026 = vst [vmem:[#allocation37_spill] sm:$0xff] %v3559_v63 }
 0x166   :  { %v940_v4 = vpop.f32.mrf.mxu0 }
 0x171   :  { %v1231_v62 = vpop.f32.mrf.mxu1 }
 0x173   :  { %v1233_v15 = vpop.f32.mrf.mxu1 }
 0x174   :  { %v1243_v17 = vcombine.low %v1231_v62, %v1233_v15 }
 0x175   :  { %v1235_v6 = vpop.f32.mrf.mxu1 }
 0x176   :  { %v1247_v4 = vadd.f32 %v1243_v17, %v4028_v3 }
 0x177   :  { %v1236_v24 = vpop.f32.mrf.mxu1 }
 0x178   :  { %v1261_v24 = vrot.slane %v1247_v4, 4 }
 0x17a   :  { %v1263_v6 = vmul.f32 0.5, %v1261_v24 }
 0x180   :  { %v1190_v16 = vpop.f32.mrf.mxu0 }
 0x182   :  { %v1192_v61 = vpop.f32.mrf.mxu0 }
 0x183   :  { %v1242_v22 = vcombine.low %v1190_v16, %v1192_v61 }
 0x184   :  { %v1194_v13 = vpop.f32.mrf.mxu0 }
 0x185   :  { %v1246_v5 = vadd.f32 %v1242_v22, %v4027_v1 }
 0x186   :  { %v1195_v2 = vpop.f32.mrf.mxu0 }
 0x187   :  { %v1248_v0 = vmul.f32 0.5, %v1246_v5  ;;  %v1253_v14 = vrot.slane %v1246_v5, 4 }
 0x189   :  { %2812 = vtanh.f32 %v1248_v0  ;;  %v1255_v63 = vmul.f32 0.5, %v1253_v14  ;;  %v4029_v0 = vmov 0  }
 0x18b   :  { %2814 = vtanh.f32 %v1255_v63 }
 0x18c   :  { %2816 = vtanh.f32 %v1247_v4 }
 0x18d   :  { %2818 = vtanh.f32 %v1263_v6 }
 0x196   :  { %v2813_v16 = vpop.eup %2812 }
 0x197   :  { %v1250_v13 = vmul.f32 0.5, %v2813_v16 }
 0x198   :  { %v2815_v15 = vpop.eup %2814 }
 0x199   :  { %v1251_v61 = vadd.f32 0.5, %v1250_v13  ;;  %v1257_v10 = vmul.f32 0.5, %v2815_v15  ;;  %v2817_v11 = vpop.eup %2816 }
 0x19a   :  { %v2819_v25 = vpop.eup %2818 }
 0x19b   :  { %v1258_v62 = vadd.f32 0.5, %v1257_v10  ;;  %v1268_v22 = vmul.f32 %v2817_v11, %v1251_v61  ;;  %v1265_v57 = vmul.f32 0.5, %v2819_v25  ;;  %v4030_v61 = vcombine.low %v3468_v9, %v3474_v18 }
 0x19d   :  { %v1267_v1 = vmul.f32 0.0, %v1258_v62  ;;  %v1266_v17 = vadd.f32 0.5, %v1265_v57 }
 0x19f   :  { %v3569_v5 = vadd.f32 %v1268_v22, %v1267_v1 }
 0x1a1   :  { %2820 = vtanh.f32 %v3569_v5 }
 0x1ae   :  { %v2821_v63 = vpop.eup %2820 }
 0x1af   :  { %v1271_v3 = vmul.f32 %v2821_v63, %v1266_v17  ;;  %v4031_v17 = vcombine.low %v3436_v7, %v3445_v12 }
 0x1b1   :  { %v1274_v2 = vpack.c.bf16 %v1271_v3, %v1271_v3 }
 0x1b3   :  { %1308 = vmatmul.mubr.bf16.vlgmr.msra.gmra.mxu0 %v1274_v2  ;;  %1349 = vmatmul.mubr.bf16.vlgmr.msra.gmra.mxu1 %v1274_v2 }
 0x1b4   :  { %1395 = vmatpush1.bf16.msra.mxu0 %v3320_v35  ;;  %1436 = vmatpush1.bf16.msra.mxu1 %v3284_v26 }
 0x1b5   :  { %1396 = vmatprep.subr.bf16.mxu0 %v3325_v37  ;;  %1437 = vmatprep.subr.bf16.mxu1 %v3286_v27 }
 0x1b6   :  { %1426 = vmatprep.mubr.bf16.mxu0 %v4029_v0  ;;  %1467 = vmatprep.mubr.bf16.mxu1 %v4029_v0 }
 0x1b8   :  { %1397 = vmatpush1.bf16.msra.mxu0 %v3332_v39  ;;  %1438 = vmatpush1.bf16.msra.mxu1 %v3292_v28 }
 0x1b9   :  { %1398 = vmatprep.subr.bf16.mxu0 %v3338_v41  ;;  %1439 = vmatprep.subr.bf16.mxu1 %v3296_v29 }
 0x1bc   :  { %1399 = vmatpush1.bf16.msra.mxu0 %v3345_v43  ;;  %1440 = vmatpush1.bf16.msra.mxu1 %v3302_v30 }
 0x1bd   :  { %1400 = vmatprep.subr.bf16.mxu0 %v3351_v45  ;;  %1441 = vmatprep.subr.bf16.mxu1 %v3305_v31 }
 0x1c0   :  { %1401 = vmatpush1.bf16.msra.mxu0 %v3357_v47  ;;  %1442 = vmatpush1.bf16.msra.mxu1 %v3312_v33 }
 0x1c1   :  { %1402 = vmatprep.subr.bf16.mxu0 %v3363_v49  ;;  %1443 = vmatprep.subr.bf16.mxu1 %v3316_v34 }
 0x1c4   :  { %1403 = vmatpush1.bf16.msra.mxu0 %v3367_v50  ;;  %1444 = vmatpush1.bf16.msra.mxu1 %v3322_v36 }
 0x1c5   :  { %1404 = vmatprep.subr.bf16.mxu0 %v3370_v51  ;;  %1445 = vmatprep.subr.bf16.mxu1 %v3327_v38 }
 0x1c8   :  { %1405 = vmatpush1.bf16.msra.mxu0 %v3375_v52  ;;  %1446 = vmatpush1.bf16.msra.mxu1 %v3334_v40 }
 0x1c9   :  { %1406 = vmatprep.subr.bf16.mxu0 %v3379_v53  ;;  %1447 = vmatprep.subr.bf16.mxu1 %v3340_v42 }
 0x1cc   :  { %1407 = vmatpush1.bf16.msra.mxu0 %v3384_v54  ;;  %1448 = vmatpush1.bf16.msra.mxu1 %v3347_v44 }
 0x1cd   :  { %1408 = vmatprep.subr.bf16.mxu0 %v3388_v55  ;;  %1449 = vmatprep.subr.bf16.mxu1 %v3353_v46 }
 0x1d0   :  { %1409 = vmatpush1.bf16.msra.mxu0 %v3392_v56  ;;  %1450 = vmatpush1.bf16.msra.mxu1 %v3359_v48 }
 0x1d1   :  { %1513 = vmatprep.subr.bf16.mxu0 %v3307_v32  ;;  %1554 = vmatprep.subr.bf16.mxu1 %v3271_v23 }
 0x273   :  { %v1309_v14 = vpop.f32.mrf.mxu0  ;;  %v1350_v4 = vpop.f32.mrf.mxu1 }
 0x275   :  { %v1311_v24 = vpop.f32.mrf.mxu0  ;;  %v1352_v6 = vpop.f32.mrf.mxu1 }
 0x276   :  { %v1361_v16 = vcombine.low %v1309_v14, %v1311_v24  ;;  %v1362_v11 = vcombine.low %v1350_v4, %v1352_v6 }
 0x277   :  { %v1313_v13 = vpop.f32.mrf.mxu0  ;;  %v1354_v15 = vpop.f32.mrf.mxu1 }
 0x278   :  { %v1365_v10 = vadd.f32 %v1361_v16, %v4030_v61  ;;  %v1366_v63 = vadd.f32 %v1362_v11, %v4031_v17 }
 0x279   :  { %v1314_v62 = vpop.f32.mrf.mxu0  ;;  %v1355_v22 = vpop.f32.mrf.mxu1 }
 0x27a   :  { %v1367_v1 = vmul.f32 0.5, %v1365_v10  ;;  %v1372_v25 = vrot.slane %v1365_v10, 4  ;;  %v1380_v3 = vrot.slane %v1366_v63, 4 }
 0x27c   :  { %2822 = vtanh.f32 %v1367_v1  ;;  %v1374_v57 = vmul.f32 0.5, %v1372_v25  ;;  %v1382_v2 = vmul.f32 0.5, %v1380_v3 }
 0x27e   :  { %2824 = vtanh.f32 %v1374_v57 }
 0x27f   :  { %2826 = vtanh.f32 %v1366_v63 }
 0x280   :  { %2828 = vtanh.f32 %v1382_v2  ;;  %v4032_v2 = vcombine.low %v3484_v8, %v3490_v20 }
 0x289   :  { %v2823_v14 = vpop.eup %2822 }
 0x28a   :  { %v1369_v24 = vmul.f32 0.5, %v2823_v14 }
 0x28b   :  { %v2825_v13 = vpop.eup %2824 }
 0x28c   :  { %v1370_v9 = vadd.f32 0.5, %v1369_v24  ;;  %v1376_v18 = vmul.f32 0.5, %v2825_v13  ;;  %v2827_v4 = vpop.eup %2826 }
 0x28d   :  { %v2829_v7 = vpop.eup %2828 }
 0x28e   :  { %v1377_v6 = vadd.f32 0.5, %v1376_v18  ;;  %v1387_v16 = vmul.f32 %v2827_v4, %v1370_v9  ;;  %v1384_v12 = vmul.f32 0.5, %v2829_v7 }
 0x290   :  { %v1386_v15 = vmul.f32 %v1377_v6, %v3569_v5  ;;  %v1385_v10 = vadd.f32 0.5, %v1384_v12 }
 0x292   :  { %v3613_v61 = vadd.f32 %v1387_v16, %v1386_v15  ;;  %v4033_v16 = vcombine.low %v3452_v21, %v3461_v58 }
 0x294   :  { %2830 = vtanh.f32 %v3613_v61 }
 0x2a1   :  { %v2831_v11 = vpop.eup %2830 }
 0x2a2   :  { %v1390_v62 = vmul.f32 %v2831_v11, %v1385_v10 }
 0x2a4   :  { %v1393_v22 = vpack.c.bf16 %v1390_v62, %v1390_v62 }
 0x2a6   :  { %1427 = vmatmul.mubr.bf16.vlgmr.msra.gmra.mxu0 %v1393_v22  ;;  %1468 = vmatmul.mubr.bf16.vlgmr.msra.gmra.mxu1 %v1393_v22 }
 0x2a7   :  { %1514 = vmatpush1.bf16.msra.mxu0 %v3320_v35  ;;  %1555 = vmatpush1.bf16.msra.mxu1 %v3284_v26 }
 0x2a8   :  { %1515 = vmatprep.subr.bf16.mxu0 %v3325_v37  ;;  %1556 = vmatprep.subr.bf16.mxu1 %v3286_v27 }
 0x2a9   :  { %1545 = vmatprep.mubr.bf16.mxu0 %v4029_v0  ;;  %1586 = vmatprep.mubr.bf16.mxu1 %v4029_v0 }
 0x2ab   :  { %1516 = vmatpush1.bf16.msra.mxu0 %v3332_v39  ;;  %1557 = vmatpush1.bf16.msra.mxu1 %v3292_v28 }
 0x2ac   :  { %1517 = vmatprep.subr.bf16.mxu0 %v3338_v41  ;;  %1558 = vmatprep.subr.bf16.mxu1 %v3296_v29 }
 0x2af   :  { %1518 = vmatpush1.bf16.msra.mxu0 %v3345_v43  ;;  %1559 = vmatpush1.bf16.msra.mxu1 %v3302_v30 }
 0x2b0   :  { %1519 = vmatprep.subr.bf16.mxu0 %v3351_v45  ;;  %1560 = vmatprep.subr.bf16.mxu1 %v3305_v31 }
 0x2b3   :  { %1520 = vmatpush1.bf16.msra.mxu0 %v3357_v47  ;;  %1561 = vmatpush1.bf16.msra.mxu1 %v3312_v33 }
 0x2b4   :  { %1521 = vmatprep.subr.bf16.mxu0 %v3363_v49  ;;  %1562 = vmatprep.subr.bf16.mxu1 %v3316_v34 }
 0x2b7   :  { %1522 = vmatpush1.bf16.msra.mxu0 %v3367_v50  ;;  %1563 = vmatpush1.bf16.msra.mxu1 %v3322_v36 }
 0x2b8   :  { %1523 = vmatprep.subr.bf16.mxu0 %v3370_v51  ;;  %1564 = vmatprep.subr.bf16.mxu1 %v3327_v38 }
 0x2bb   :  { %1524 = vmatpush1.bf16.msra.mxu0 %v3375_v52  ;;  %1565 = vmatpush1.bf16.msra.mxu1 %v3334_v40 }
 0x2bc   :  { %1525 = vmatprep.subr.bf16.mxu0 %v3379_v53  ;;  %1566 = vmatprep.subr.bf16.mxu1 %v3340_v42 }
 0x2bf   :  { %1526 = vmatpush1.bf16.msra.mxu0 %v3384_v54  ;;  %1567 = vmatpush1.bf16.msra.mxu1 %v3347_v44 }
 0x2c0   :  { %1527 = vmatprep.subr.bf16.mxu0 %v3388_v55  ;;  %1568 = vmatprep.subr.bf16.mxu1 %v3353_v46 }
 0x2c3   :  { %1528 = vmatpush1.bf16.msra.mxu0 %v3392_v56  ;;  %1569 = vmatpush1.bf16.msra.mxu1 %v3359_v48 }
 0x2c4   :  { %1632 = vmatprep.subr.bf16.mxu0 %v3307_v32  ;;  %1673 = vmatprep.subr.bf16.mxu1 %v3271_v23 }
 0x366   :  { %v1428_v5 = vpop.f32.mrf.mxu0  ;;  %v1469_v1 = vpop.f32.mrf.mxu1 }
 0x368   :  { %v1430_v25 = vpop.f32.mrf.mxu0  ;;  %v1471_v57 = vpop.f32.mrf.mxu1 }
 0x369   :  { %v1480_v17 = vcombine.low %v1428_v5, %v1430_v25  ;;  %v1481_v24 = vcombine.low %v1469_v1, %v1471_v57 }
 0x36a   :  { %v1432_v63 = vpop.f32.mrf.mxu0  ;;  %v1473_v3 = vpop.f32.mrf.mxu1 }
 0x36b   :  { %v1484_v14 = vadd.f32 %v1480_v17, %v4032_v2  ;;  %v1485_v15 = vadd.f32 %v1481_v24, %v4033_v16  ;;  %v4035_v16 = vld [vmem:[#allocation27_spill] sm:$0xff] }
 0x36c   :  { %v1433_v13 = vpop.f32.mrf.mxu0  ;;  %v1474_v9 = vpop.f32.mrf.mxu1 }
 0x36d   :  { %v1486_v18 = vmul.f32 0.5, %v1484_v14  ;;  %v1491_v4 = vrot.slane %v1484_v14, 4  ;;  %v1499_v7 = vrot.slane %v1485_v15, 4 }
 0x36f   :  { %2832 = vtanh.f32 %v1486_v18  ;;  %v1493_v6 = vmul.f32 0.5, %v1491_v4  ;;  %v1501_v12 = vmul.f32 0.5, %v1499_v7 }
 0x371   :  { %2834 = vtanh.f32 %v1493_v6  ;;  %v4034_v6 = vld [vmem:[#allocation25_spill] sm:$0xff] }
 0x372   :  { %2836 = vtanh.f32 %v1485_v15  ;;  %v4036_v15 = vcombine.low %v4034_v6, %v4035_v16 }
 0x373   :  { %2838 = vtanh.f32 %v1501_v12 }
 0x37c   :  { %v2833_v10 = vpop.eup %2832 }
 0x37d   :  { %v1488_v11 = vmul.f32 0.5, %v2833_v10 }
 0x37e   :  { %v2835_v62 = vpop.eup %2834 }
 0x37f   :  { %v1489_v8 = vadd.f32 0.5, %v1488_v11  ;;  %v1495_v20 = vmul.f32 0.5, %v2835_v62  ;;  %v2837_v22 = vpop.eup %2836 }
 0x380   :  { %v2839_v21 = vpop.eup %2838 }
 0x381   :  { %v1496_v5 = vadd.f32 0.5, %v1495_v20  ;;  %v1506_v1 = vmul.f32 %v2837_v22, %v1489_v8  ;;  %v1503_v58 = vmul.f32 0.5, %v2839_v21  ;;  %v4037_v20 = vld [vmem:[#allocation21_spill] sm:$0xff] }
 0x383   :  { %v1505_v25 = vmul.f32 %v1496_v5, %v3613_v61  ;;  %v1504_v17 = vadd.f32 0.5, %v1503_v58 }
 0x385   :  { %v3657_v57 = vadd.f32 %v1506_v1, %v1505_v25 }
 0x387   :  { %2840 = vtanh.f32 %v3657_v57 }
 0x394   :  { %v2841_v63 = vpop.eup %2840 }
 0x395   :  { %v1509_v3 = vmul.f32 %v2841_v63, %v1504_v17 }
 0x397   :  { %v1512_v2 = vpack.c.bf16 %v1509_v3, %v1509_v3 }
 0x399   :  { %1546 = vmatmul.mubr.bf16.vlgmr.msra.gmra.mxu0 %v1512_v2  ;;  %1587 = vmatmul.mubr.bf16.vlgmr.msra.gmra.mxu1 %v1512_v2 }
 0x39a   :  { %1633 = vmatpush1.bf16.msra.mxu0 %v3320_v35  ;;  %1674 = vmatpush1.bf16.msra.mxu1 %v3284_v26 }
 0x39b   :  { %1634 = vmatprep.subr.bf16.mxu0 %v3325_v37  ;;  %1675 = vmatprep.subr.bf16.mxu1 %v3286_v27 }
 0x39c   :  { %1664 = vmatprep.mubr.bf16.mxu0 %v4029_v0  ;;  %1705 = vmatprep.mubr.bf16.mxu1 %v4029_v0 }
 0x39e   :  { %1635 = vmatpush1.bf16.msra.mxu0 %v3332_v39  ;;  %1676 = vmatpush1.bf16.msra.mxu1 %v3292_v28 }
 0x39f   :  { %1636 = vmatprep.subr.bf16.mxu0 %v3338_v41  ;;  %1677 = vmatprep.subr.bf16.mxu1 %v3296_v29 }
 0x3a2   :  { %1637 = vmatpush1.bf16.msra.mxu0 %v3345_v43  ;;  %1678 = vmatpush1.bf16.msra.mxu1 %v3302_v30 }
 0x3a3   :  { %1638 = vmatprep.subr.bf16.mxu0 %v3351_v45  ;;  %1679 = vmatprep.subr.bf16.mxu1 %v3305_v31 }
 0x3a6   :  { %1639 = vmatpush1.bf16.msra.mxu0 %v3357_v47  ;;  %1680 = vmatpush1.bf16.msra.mxu1 %v3312_v33 }
 0x3a7   :  { %1640 = vmatprep.subr.bf16.mxu0 %v3363_v49  ;;  %1681 = vmatprep.subr.bf16.mxu1 %v3316_v34 }
 0x3aa   :  { %1641 = vmatpush1.bf16.msra.mxu0 %v3367_v50  ;;  %1682 = vmatpush1.bf16.msra.mxu1 %v3322_v36 }
 0x3ab   :  { %1642 = vmatprep.subr.bf16.mxu0 %v3370_v51  ;;  %1683 = vmatprep.subr.bf16.mxu1 %v3327_v38 }
 0x3ae   :  { %1643 = vmatpush1.bf16.msra.mxu0 %v3375_v52  ;;  %1684 = vmatpush1.bf16.msra.mxu1 %v3334_v40 }
 0x3af   :  { %1644 = vmatprep.subr.bf16.mxu0 %v3379_v53  ;;  %1685 = vmatprep.subr.bf16.mxu1 %v3340_v42 }
 0x3b2   :  { %1645 = vmatpush1.bf16.msra.mxu0 %v3384_v54  ;;  %1686 = vmatpush1.bf16.msra.mxu1 %v3347_v44 }
 0x3b3   :  { %1646 = vmatprep.subr.bf16.mxu0 %v3388_v55  ;;  %1687 = vmatprep.subr.bf16.mxu1 %v3353_v46 }
 0x3b6   :  { %1647 = vmatpush1.bf16.msra.mxu0 %v3392_v56  ;;  %1688 = vmatpush1.bf16.msra.mxu1 %v3359_v48 }
 0x3b7   :  { %1751 = vmatprep.subr.bf16.mxu0 %v3307_v32  ;;  %1792 = vmatprep.subr.bf16.mxu1 %v3271_v23  ;;  %v4038_v23 = vld [vmem:[#allocation22_spill] sm:$0xff] }
 0x3b8   :  { %v4039_v22 = vcombine.low %v4037_v20, %v4038_v23  ;;  %v3755_v20 = vld [vmem:[#allocation6 + $0xe8] ss:$16 sps:$4 sm:$0xff]   ;;  %v3758_v23 = vld [vmem:[#allocation6 + $0xc4] ss:$16 sps:$4 sm:$0xff]  }
 0x459   :  { %v1547_v61 = vpop.f32.mrf.mxu0  ;;  %v1588_v14 = vpop.f32.mrf.mxu1 }
 0x45b   :  { %v1549_v24 = vpop.f32.mrf.mxu0  ;;  %v1590_v13 = vpop.f32.mrf.mxu1 }
 0x45c   :  { %v1599_v9 = vcombine.low %v1547_v61, %v1549_v24  ;;  %v1600_v12 = vcombine.low %v1588_v14, %v1590_v13 }
 0x45d   :  { %v1551_v18 = vpop.f32.mrf.mxu0  ;;  %v1592_v4 = vpop.f32.mrf.mxu1 }
 0x45e   :  { %v1603_v7 = vadd.f32 %v1599_v9, %v4036_v15  ;;  %v1604_v5 = vadd.f32 %v1600_v12, %v4039_v22  ;;  %v3761_v22 = vld [vmem:[#allocation6 + $0xcc] ss:$16 sps:$4 sm:$0xff]  }
 0x45f   :  { %v1552_v10 = vpop.f32.mrf.mxu0  ;;  %v1593_v11 = vpop.f32.mrf.mxu1 }
 0x460   :  { %v1605_v62 = vmul.f32 0.5, %v1603_v7  ;;  %v1610_v8 = vrot.slane %v1603_v7, 4  ;;  %v1618_v1 = vrot.slane %v1604_v5, 4 }
 0x462   :  { %2842 = vtanh.f32 %v1605_v62  ;;  %v1612_v32 = vmul.f32 0.5, %v1610_v8  ;;  %v1620_v25 = vmul.f32 0.5, %v1618_v1  ;;  %v3769_v1 = vld [vmem:[#allocation6 + $0xc8] ss:$16 sps:$4 sm:$0xff]  }
 0x464   :  { %2844 = vtanh.f32 %v1612_v32  ;;  %v3752_v32 = vld [vmem:[#allocation6 + $0xe0] ss:$16 sps:$4 sm:$0xff]  }
 0x465   :  { %2846 = vtanh.f32 %v1604_v5  ;;  %v3766_v5 = vld [vmem:[#allocation6 + $0xc0] ss:$16 sps:$4 sm:$0xff]  }
 0x466   :  { %2848 = vtanh.f32 %v1620_v25  ;;  %v3772_v25 = vld [vmem:[#allocation6 + $0xa4] ss:$16 sps:$4 sm:$0xff]  }
 0x46f   :  { %v2843_v21 = vpop.eup %2842 }
 0x470   :  { %v1607_v58 = vmul.f32 0.5, %v2843_v21  ;;  %v3775_v21 = vld [vmem:[#allocation6 + $0xac] ss:$16 sps:$4 sm:$0xff]  }
 0x471   :  { %v2845_v17 = vpop.eup %2844 }
 0x472   :  { %v1608_v63 = vadd.f32 0.5, %v1607_v58  ;;  %v1614_v3 = vmul.f32 0.5, %v2845_v17  ;;  %v2847_v2 = vpop.eup %2846  ;;  %v3778_v58 = vld [vmem:[#allocation6 + $0xa0] ss:$16 sps:$4 sm:$0xff]   ;;  %v3781_v17 = vld [vmem:[#allocation6 + $0xa8] ss:$16 sps:$4 sm:$0xff]  }
 0x473   :  { %v2849_v9 = vpop.eup %2848 }
 0x474   :  { %v1615_v61 = vadd.f32 0.5, %v1614_v3  ;;  %v1625_v14 = vmul.f32 %v2847_v2, %v1608_v63  ;;  %v1622_v18 = vmul.f32 0.5, %v2849_v9  ;;  %v3784_v63 = vld [vmem:[#allocation6 + $0x84] ss:$16 sps:$4 sm:$0xff]   ;;  %v3787_v3 = vld [vmem:[#allocation6 + $0x8c] ss:$16 sps:$4 sm:$0xff]  }
 0x475   :  { %v3790_v2 = vld [vmem:[#allocation6 + $0x80] ss:$16 sps:$4 sm:$0xff]   ;;  %v3805_v9 = vld [vmem:[#allocation6 + $0x68] ss:$16 sps:$4 sm:$0xff]  }
 0x476   :  { %v1624_v24 = vmul.f32 %v1615_v61, %v3657_v57  ;;  %v1623_v4 = vadd.f32 0.5, %v1622_v18  ;;  %v3793_v61 = vld [vmem:[#allocation6 + $0x88] ss:$16 sps:$4 sm:$0xff]   ;;  %v3808_v18 = vld [vmem:[#allocation6 + $0x44] ss:$16 sps:$4 sm:$0xff]  }
 0x478   :  { %v3701_v13 = vadd.f32 %v1625_v14, %v1624_v24  ;;  %v3796_v14 = vld [vmem:[#allocation6 + $0x64] ss:$16 sps:$4 sm:$0xff]   ;;  %v3799_v24 = vld [vmem:[#allocation6 + $0x6c] ss:$16 sps:$4 sm:$0xff]  }
 0x47a   :  { %2850 = vtanh.f32 %v3701_v13 }
 0x487   :  { %v2851_v6 = vpop.eup %2850 }
 0x488   :  { %v1628_v16 = vmul.f32 %v2851_v6, %v1623_v4  ;;  %v3811_v4 = vld [vmem:[#allocation6 + $0x4c] ss:$16 sps:$4 sm:$0xff]   ;;  %v3814_v6 = vld [vmem:[#allocation6 + $0x40] ss:$16 sps:$4 sm:$0xff]  }
 0x48a   :  { %v1631_v15 = vpack.c.bf16 %v1628_v16, %v1628_v16  ;;  %v3817_v16 = vld [vmem:[#allocation6 + $0x48] ss:$16 sps:$4 sm:$0xff]  }
 0x48c   :  { %1665 = vmatmul.mubr.bf16.vlgmr.msra.gmra.mxu0 %v1631_v15  ;;  %1706 = vmatmul.mubr.bf16.vlgmr.msra.gmra.mxu1 %v1631_v15  ;;  %v3820_v15 = vld [vmem:[#allocation6 + $0x24] ss:$16 sps:$4 sm:$0xff]  }
 0x48d   :  { %1752 = vmatpush1.bf16.msra.mxu0 %v3320_v35  ;;  %1793 = vmatpush1.bf16.msra.mxu1 %v3284_v26  ;;  %v3736_v26 = vld [vmem:[#allocation6 + $0xe4] ss:$16 sps:$4 sm:$0xff]  }
 0x48e   :  { %1753 = vmatprep.subr.bf16.mxu0 %v3325_v37  ;;  %1794 = vmatprep.subr.bf16.mxu1 %v3286_v27  ;;  %v3739_v27 = vld [vmem:[#allocation6 + $0xec] ss:$16 sps:$4 sm:$0xff]  }
 0x48f   :  { %1783 = vmatprep.mubr.bf16.mxu0 %v4029_v0  ;;  %1824 = vmatprep.mubr.bf16.mxu1 %v4029_v0 }
 0x491   :  { %1754 = vmatpush1.bf16.msra.mxu0 %v3332_v39  ;;  %1795 = vmatpush1.bf16.msra.mxu1 %v3292_v28 }
 0x492   :  { %1755 = vmatprep.subr.bf16.mxu0 %v3338_v41  ;;  %1796 = vmatprep.subr.bf16.mxu1 %v3296_v29 }
 0x495   :  { %1756 = vmatpush1.bf16.msra.mxu0 %v3345_v43  ;;  %1797 = vmatpush1.bf16.msra.mxu1 %v3302_v30 }
 0x496   :  { %1757 = vmatprep.subr.bf16.mxu0 %v3351_v45  ;;  %1798 = vmatprep.subr.bf16.mxu1 %v3305_v31  ;;  %v4042_v45 = vld [vmem:[#allocation24_spill] sm:$0xff] }
 0x499   :  { %1758 = vmatpush1.bf16.msra.mxu0 %v3357_v47  ;;  %1799 = vmatpush1.bf16.msra.mxu1 %v3312_v33 }
 0x49a   :  { %1759 = vmatprep.subr.bf16.mxu0 %v3363_v49  ;;  %1800 = vmatprep.subr.bf16.mxu1 %v3316_v34 }
 0x49d   :  { %1760 = vmatpush1.bf16.msra.mxu0 %v3367_v50  ;;  %1801 = vmatpush1.bf16.msra.mxu1 %v3322_v36  ;;  %v4040_v36 = vcombine.low %v3516_v19, %v3522_v60 }
 0x49e   :  { %1761 = vmatprep.subr.bf16.mxu0 %v3370_v51  ;;  %1802 = vmatprep.subr.bf16.mxu1 %v3327_v38 }
 0x4a1   :  { %1762 = vmatpush1.bf16.msra.mxu0 %v3375_v52  ;;  %1803 = vmatpush1.bf16.msra.mxu1 %v3334_v40 }
 0x4a2   :  { %1763 = vmatprep.subr.bf16.mxu0 %v3379_v53  ;;  %1804 = vmatprep.subr.bf16.mxu1 %v3340_v42 }
 0x4a5   :  { %1764 = vmatpush1.bf16.msra.mxu0 %v3384_v54  ;;  %1805 = vmatpush1.bf16.msra.mxu1 %v3347_v44  ;;  %v4041_v44 = vld [vmem:[#allocation23_spill] sm:$0xff] }
 0x4a6   :  { %1765 = vmatprep.subr.bf16.mxu0 %v3388_v55  ;;  %1806 = vmatprep.subr.bf16.mxu1 %v3353_v46  ;;  %v4043_v46 = vcombine.low %v4041_v44, %v4042_v45  ;;  %v4045_v44 = vld [vmem:[#allocation33_spill] sm:$0xff] }
 0x4a9   :  { %1766 = vmatpush1.bf16.msra.mxu0 %v3392_v56  ;;  %1807 = vmatpush1.bf16.msra.mxu1 %v3359_v48 }
 0x4aa   :  { %1870 = vmatprep.subr.bf16.mxu0 %v3736_v26  ;;  %1911 = vmatprep.subr.bf16.mxu1 %v3739_v27 }
 0x54c   :  { %v1666_v28 = vpop.f32.mrf.mxu0  ;;  %v1707_v29 = vpop.f32.mrf.mxu1 }
 0x54e   :  { %v1668_v30 = vpop.f32.mrf.mxu0  ;;  %v1709_v31 = vpop.f32.mrf.mxu1 }
 0x54f   :  { %v1718_v33 = vcombine.low %v1666_v28, %v1668_v30  ;;  %v1719_v38 = vcombine.low %v1707_v29, %v1709_v31  ;;  %v3823_v28 = vld [vmem:[#allocation6 + $0x2c] ss:$16 sps:$4 sm:$0xff]   ;;  %v3826_v29 = vld [vmem:[#allocation6 + $0x20] ss:$16 sps:$4 sm:$0xff]   ;;  %v3829_v30 = vld [vmem:[#allocation6 + $0x28] ss:$16 sps:$4 sm:$0xff]  }
 0x550   :  { %v1670_v34 = vpop.f32.mrf.mxu0  ;;  %v1711_v35 = vpop.f32.mrf.mxu1  ;;  %v3832_v31 = vld [vmem:[#allocation6 + $0x4] ss:$16 sps:$4 sm:$0xff]  }
 0x551   :  { %v1722_v37 = vadd.f32 %v1718_v33, %v4040_v36  ;;  %v1723_v47 = vadd.f32 %v1719_v38, %v4043_v46  ;;  %v3835_v33 = vld [vmem:[#allocation6 + $0xc] ss:$16 sps:$4 sm:$0xff]   ;;  %v3838_v34 = vld [vmem:[#allocation6] ss:$16 sps:$4 sm:$0xff]   ;;  %v3841_v35 = vld [vmem:[#allocation6 + $0x8] ss:$16 sps:$4 sm:$0xff]  }
 0x552   :  { %v1671_v39 = vpop.f32.mrf.mxu0  ;;  %v1712_v40 = vpop.f32.mrf.mxu1 }
 0x553   :  { %v1724_v41 = vmul.f32 0.5, %v1722_v37  ;;  %v1729_v42 = vrot.slane %v1722_v37, 4  ;;  %v1737_v48 = vrot.slane %v1723_v47, 4 }
 0x555   :  { %2852 = vtanh.f32 %v1724_v41  ;;  %v1731_v43 = vmul.f32 0.5, %v1729_v42  ;;  %v1739_v49 = vmul.f32 0.5, %v1737_v48 }
 0x557   :  { %2854 = vtanh.f32 %v1731_v43  ;;  %v4044_v43 = vld [vmem:[#allocation31_spill] sm:$0xff] }
 0x558   :  { %2856 = vtanh.f32 %v1723_v47  ;;  %v4046_v45 = vcombine.low %v4044_v43, %v4045_v44 }
 0x559   :  { %2858 = vtanh.f32 %v1739_v49 }
 0x562   :  { %v2853_v50 = vpop.eup %2852 }
 0x563   :  { %v1726_v51 = vmul.f32 0.5, %v2853_v50 }
 0x564   :  { %v2855_v52 = vpop.eup %2854 }
 0x565   :  { %v1727_v53 = vadd.f32 0.5, %v1726_v51  ;;  %v1733_v54 = vmul.f32 0.5, %v2855_v52  ;;  %v2857_v55 = vpop.eup %2856  ;;  %v4047_v52 = vld [vmem:[#allocation26_spill] sm:$0xff] }
 0x566   :  { %v2859_v7 = vpop.eup %2858 }
 0x567   :  { %v1734_v56 = vadd.f32 0.5, %v1733_v54  ;;  %v1744_v19 = vmul.f32 %v2857_v55, %v1727_v53  ;;  %v1741_v12 = vmul.f32 0.5, %v2859_v7 }
 0x569   :  { %v1743_v60 = vmul.f32 %v1734_v56, %v3701_v13  ;;  %v1742_v10 = vadd.f32 0.5, %v1741_v12  ;;  %v3802_v13 = vld [vmem:[#allocation6 + $0x60] ss:$16 sps:$4 sm:$0xff]  }
 0x56b   :  { %v3749_v57 = vadd.f32 %v1744_v19, %v1743_v60 }
 0x56d   :  { %2860 = vtanh.f32 %v3749_v57 }
 0x57a   :  { %v2861_v11 = vpop.eup %2860 }
 0x57b   :  { %v1747_v62 = vmul.f32 %v2861_v11, %v1742_v10 }
 0x57d   :  { %v1750_v8 = vpack.c.bf16 %v1747_v62, %v1747_v62 }
 0x57f   :  { %1784 = vmatmul.mubr.bf16.vlgmr.msra.gmra.mxu0 %v1750_v8  ;;  %1825 = vmatmul.mubr.bf16.vlgmr.msra.gmra.mxu1 %v1750_v8 }
 0x580   :  { %1871 = vmatpush1.bf16.msra.mxu0 %v3752_v32  ;;  %1912 = vmatpush1.bf16.msra.mxu1 %v3755_v20 }
 0x581   :  { %1872 = vmatprep.subr.bf16.mxu0 %v3758_v23  ;;  %1913 = vmatprep.subr.bf16.mxu1 %v3761_v22 }
 0x582   :  { %1902 = vmatprep.mubr.bf16.mxu0 %v4029_v0  ;;  %1943 = vmatprep.mubr.bf16.mxu1 %v4029_v0 }
 0x584   :  { %1873 = vmatpush1.bf16.msra.mxu0 %v3766_v5  ;;  %1914 = vmatpush1.bf16.msra.mxu1 %v3769_v1 }
 0x585   :  { %1874 = vmatprep.subr.bf16.mxu0 %v3772_v25  ;;  %1915 = vmatprep.subr.bf16.mxu1 %v3775_v21 }
 0x588   :  { %1875 = vmatpush1.bf16.msra.mxu0 %v3778_v58  ;;  %1916 = vmatpush1.bf16.msra.mxu1 %v3781_v17 }
 0x589   :  { %1876 = vmatprep.subr.bf16.mxu0 %v3784_v63  ;;  %1917 = vmatprep.subr.bf16.mxu1 %v3787_v3 }
 0x58c   :  { %1877 = vmatpush1.bf16.msra.mxu0 %v3790_v2  ;;  %1918 = vmatpush1.bf16.msra.mxu1 %v3793_v61 }
 0x58d   :  { %1878 = vmatprep.subr.bf16.mxu0 %v3796_v14  ;;  %1919 = vmatprep.subr.bf16.mxu1 %v3799_v24 }
 0x590   :  { %1879 = vmatpush1.bf16.msra.mxu0 %v3802_v13  ;;  %1920 = vmatpush1.bf16.msra.mxu1 %v3805_v9 }
 0x591   :  { %1880 = vmatprep.subr.bf16.mxu0 %v3808_v18  ;;  %1921 = vmatprep.subr.bf16.mxu1 %v3811_v4 }
 0x594   :  { %1881 = vmatpush1.bf16.msra.mxu0 %v3814_v6  ;;  %1922 = vmatpush1.bf16.msra.mxu1 %v3817_v16 }
 0x595   :  { %1882 = vmatprep.subr.bf16.mxu0 %v3820_v15  ;;  %1923 = vmatprep.subr.bf16.mxu1 %v3823_v28 }
 0x598   :  { %1883 = vmatpush1.bf16.msra.mxu0 %v3826_v29  ;;  %1924 = vmatpush1.bf16.msra.mxu1 %v3829_v30 }
 0x599   :  { %1884 = vmatprep.subr.bf16.mxu0 %v3832_v31  ;;  %1925 = vmatprep.subr.bf16.mxu1 %v3835_v33 }
 0x59c   :  { %1885 = vmatpush1.bf16.msra.mxu0 %v3838_v34  ;;  %1926 = vmatpush1.bf16.msra.mxu1 %v3841_v35 }
 0x59d   :  { %1989 = vmatprep.subr.bf16.mxu0 %v3736_v26  ;;  %2030 = vmatprep.subr.bf16.mxu1 %v3739_v27  ;;  %v4048_v27 = vld [vmem:[#allocation28_spill] sm:$0xff] }
 0x59e   :  { %v4049_v53 = vcombine.low %v4047_v52, %v4048_v27  ;;  %v2797_v52 = vld [vmem:[#allocation9 + $0x30] sm:$0xff]   ;;  %v2798_v27 = vld [vmem:[#allocation9 + $0x28] sm:$0xff]  }
 0x63f   :  { %v1785_v36 = vpop.f32.mrf.mxu0  ;;  %v1826_v37 = vpop.f32.mrf.mxu1 }
 0x641   :  { %v1787_v38 = vpop.f32.mrf.mxu0  ;;  %v1828_v39 = vpop.f32.mrf.mxu1 }
 0x642   :  { %v1837_v40 = vcombine.low %v1785_v36, %v1787_v38  ;;  %v1838_v47 = vcombine.low %v1826_v37, %v1828_v39 }
 0x643   :  { %v1789_v41 = vpop.f32.mrf.mxu0  ;;  %v1830_v42 = vpop.f32.mrf.mxu1 }
 0x644   :  { %v1841_v46 = vadd.f32 %v1837_v40, %v4046_v45  ;;  %v1842_v54 = vadd.f32 %v1838_v47, %v4049_v53  ;;  %v2799_v53 = vld [vmem:[#allocation9 + $0x20] sm:$0xff]  }
 0x645   :  { %v1790_v48 = vpop.f32.mrf.mxu0  ;;  %v1831_v49 = vpop.f32.mrf.mxu1 }
 0x646   :  { %v1843_v50 = vmul.f32 0.5, %v1841_v46  ;;  %v1848_v51 = vrot.slane %v1841_v46, 4  ;;  %v1856_v55 = vrot.slane %v1842_v54, 4 }
 0x648   :  { %2862 = vtanh.f32 %v1843_v50  ;;  %v1850_v26 = vmul.f32 0.5, %v1848_v51  ;;  %v1858_v56 = vmul.f32 0.5, %v1856_v55  ;;  %v2796_v51 = vld [vmem:[#allocation9 + $0x38] sm:$0xff]   ;;  %v2801_v55 = vld [vmem:[#allocation9 + $0x10] sm:$0xff]  }
 0x64a   :  { %2864 = vtanh.f32 %v1850_v26  ;;  %v3108_v26 = vmov 0.0  }
 0x64b   :  { %2866 = vtanh.f32 %v1842_v54  ;;  %v2800_v54 = vld [vmem:[#allocation9 + $0x18] sm:$0xff]  }
 0x64c   :  { %2868 = vtanh.f32 %v1858_v56  ;;  %v2802_v56 = vld [vmem:[#allocation9 + $0x8] sm:$0xff]  }
 0x655   :  { %v2863_v19 = vpop.eup %2862 }
 0x656   :  { %v1845_v60 = vmul.f32 0.5, %v2863_v19  ;;  %v2803_v19 = vld [vmem:[#allocation9] sm:$0xff]  }
 0x657   :  { %v2865_v7 = vpop.eup %2864 }
 0x658   :  { %v1846_v12 = vadd.f32 0.5, %v1845_v60  ;;  %v1852_v10 = vmul.f32 0.5, %v2865_v7  ;;  %v2867_v11 = vpop.eup %2866  ;;  %v2804_v60 = vld [vmem:[%s3986_s6 + $0x38] sm:$0xff]   ;;  %v2805_v7 = vld [vmem:[%s3986_s6 + $0x30] sm:$0xff]  }
 0x659   :  { %v2869_v38 = vpop.eup %2868 }
 0x65a   :  { %v1853_v62 = vadd.f32 0.5, %v1852_v10  ;;  %v1863_v8 = vmul.f32 %v2867_v11, %v1846_v12  ;;  %v1860_v39 = vmul.f32 0.5, %v2869_v38  ;;  %v2806_v12 = vld [vmem:[%s3986_s6 + $0x28] sm:$0xff]   ;;  %v2807_v10 = vld [vmem:[%s3986_s6 + $0x20] sm:$0xff]   ;;  %v2808_v11 = vld [vmem:[%s3986_s6 + $0x18] sm:$0xff]  }
 0x65c   :  { %v1862_v36 = vmul.f32 %v1853_v62, %v3749_v57  ;;  %v1861_v40 = vadd.f32 0.5, %v1860_v39  ;;  %v2809_v62 = vld [vmem:[%s3986_s6 + $0x10] sm:$0xff]  }
 0x65e   :  { %v3853_v37 = vadd.f32 %v1863_v8, %v1862_v36 }
 0x660   :  { %2870 = vtanh.f32 %v3853_v37 }
 0x66d   :  { %v2871_v41 = vpop.eup %2870 }
 0x66e   :  { %v1866_v42 = vmul.f32 %v2871_v41, %v1861_v40 }
 0x670   :  { %v1869_v43 = vpack.c.bf16 %v1866_v42, %v1866_v42  ;;  %v4056_v42 = vld [vmem:[#allocation37_spill] sm:$0xff] }
 0x672   :  { %1903 = vmatmul.mubr.bf16.vlgmr.msra.gmra.mxu0 %v1869_v43  ;;  %1944 = vmatmul.mubr.bf16.vlgmr.msra.gmra.mxu1 %v1869_v43  ;;  %v4057_v43 = vcombine.low %v3556_v59, %v4056_v42 }
 0x673   :  { %1990 = vmatpush1.bf16.msra.mxu0 %v3752_v32  ;;  %2031 = vmatpush1.bf16.msra.mxu1 %v3755_v20 }
 0x674   :  { %1991 = vmatprep.subr.bf16.mxu0 %v3758_v23  ;;  %2032 = vmatprep.subr.bf16.mxu1 %v3761_v22 }
 0x675   :  { %2021 = vmatprep.mubr.bf16.mxu0 %v4029_v0  ;;  %2062 = vmatprep.mubr.bf16.mxu1 %v4029_v0 }
 0x677   :  { %1992 = vmatpush1.bf16.msra.mxu0 %v3766_v5  ;;  %2033 = vmatpush1.bf16.msra.mxu1 %v3769_v1  ;;  %v4050_v1 = vld [vmem:[#allocation35_spill] sm:$0xff] }
 0x678   :  { %1993 = vmatprep.subr.bf16.mxu0 %v3772_v25  ;;  %2034 = vmatprep.subr.bf16.mxu1 %v3775_v21  ;;  %v4051_v25 = vld [vmem:[#allocation36_spill] sm:$0xff] }
 0x679   :  { %v4052_v21 = vcombine.low %v4050_v1, %v4051_v25  ;;  %v4058_v1 = vld [vmem:[#allocation32_spill] sm:$0xff]  ;;  %v4059_v25 = vld [vmem:[#allocation34_spill] sm:$0xff] }
 0x67b   :  { %1994 = vmatpush1.bf16.msra.mxu0 %v3778_v58  ;;  %2035 = vmatpush1.bf16.msra.mxu1 %v3781_v17 }
 0x67c   :  { %1995 = vmatprep.subr.bf16.mxu0 %v3784_v63  ;;  %2036 = vmatprep.subr.bf16.mxu1 %v3787_v3 }
 0x67f   :  { %1996 = vmatpush1.bf16.msra.mxu0 %v3790_v2  ;;  %2037 = vmatpush1.bf16.msra.mxu1 %v3793_v61 }
 0x680   :  { %1997 = vmatprep.subr.bf16.mxu0 %v3796_v14  ;;  %2038 = vmatprep.subr.bf16.mxu1 %v3799_v24  ;;  %v4053_v24 = vld [vmem:[#allocation29_spill] sm:$0xff] }
 0x683   :  { %1998 = vmatpush1.bf16.msra.mxu0 %v3802_v13  ;;  %2039 = vmatpush1.bf16.msra.mxu1 %v3805_v9  ;;  %v4054_v13 = vld [vmem:[#allocation30_spill] sm:$0xff] }
 0x684   :  { %1999 = vmatprep.subr.bf16.mxu0 %v3808_v18  ;;  %2040 = vmatprep.subr.bf16.mxu1 %v3811_v4  ;;  %v4055_v9 = vcombine.low %v4053_v24, %v4054_v13 }
 0x687   :  { %2000 = vmatpush1.bf16.msra.mxu0 %v3814_v6  ;;  %2041 = vmatpush1.bf16.msra.mxu1 %v3817_v16 }
 0x688   :  { %2001 = vmatprep.subr.bf16.mxu0 %v3820_v15  ;;  %2042 = vmatprep.subr.bf16.mxu1 %v3823_v28 }
 0x68b   :  { %2002 = vmatpush1.bf16.msra.mxu0 %v3826_v29  ;;  %2043 = vmatpush1.bf16.msra.mxu1 %v3829_v30 }
 0x68c   :  { %2003 = vmatprep.subr.bf16.mxu0 %v3832_v31  ;;  %2044 = vmatprep.subr.bf16.mxu1 %v3835_v33 }
 0x68f   :  { %2004 = vmatpush1.bf16.msra.mxu0 %v3838_v34  ;;  %2045 = vmatpush1.bf16.msra.mxu1 %v3841_v35 }
 0x690   :  { %2647 = vmatprep.subr.bf16.mxu0 %v3108_v26  ;;  %2667 = vmatprep.subr.bf16.mxu1 %v3108_v26 }
 0x732   :  { %v1904_v0 = vpop.f32.mrf.mxu0  ;;  %v1945_v57 = vpop.f32.mrf.mxu1 }
 0x734   :  { %v1906_v32 = vpop.f32.mrf.mxu0  ;;  %v1947_v20 = vpop.f32.mrf.mxu1 }
 0x735   :  { %v1956_v23 = vcombine.low %v1904_v0, %v1906_v32  ;;  %v1957_v17 = vcombine.low %v1945_v57, %v1947_v20 }
 0x736   :  { %v1908_v22 = vpop.f32.mrf.mxu0  ;;  %v1949_v5 = vpop.f32.mrf.mxu1 }
 0x737   :  { %v1960_v58 = vadd.f32 %v1956_v23, %v4052_v21  ;;  %v1961_v18 = vadd.f32 %v1957_v17, %v4055_v9  ;;  %v4060_v21 = vcombine.low %v4058_v1, %v4059_v25 }
 0x738   :  { %v1909_v63 = vpop.f32.mrf.mxu0  ;;  %v1950_v3 = vpop.f32.mrf.mxu1 }
 0x739   :  { %v1962_v2 = vmul.f32 0.5, %v1960_v58  ;;  %v1967_v61 = vrot.slane %v1960_v58, 4  ;;  %v1975_v4 = vrot.slane %v1961_v18, 4 }
 0x73b   :  { %2872 = vtanh.f32 %v1962_v2  ;;  %v1969_v14 = vmul.f32 0.5, %v1967_v61  ;;  %v1977_v6 = vmul.f32 0.5, %v1975_v4 }
 0x73d   :  { %2874 = vtanh.f32 %v1969_v14 }
 0x73e   :  { %2876 = vtanh.f32 %v1961_v18 }
 0x73f   :  { %2878 = vtanh.f32 %v1977_v6 }
 0x748   :  { %v2873_v16 = vpop.eup %2872 }
 0x749   :  { %v1964_v15 = vmul.f32 0.5, %v2873_v16 }
 0x74a   :  { %v2875_v28 = vpop.eup %2874 }
 0x74b   :  { %v1965_v29 = vadd.f32 0.5, %v1964_v15  ;;  %v1971_v30 = vmul.f32 0.5, %v2875_v28  ;;  %v2877_v31 = vpop.eup %2876 }
 0x74c   :  { %v2879_v45 = vpop.eup %2878 }
 0x74d   :  { %v1972_v33 = vadd.f32 0.5, %v1971_v30  ;;  %v1982_v34 = vmul.f32 %v2877_v31, %v1965_v29  ;;  %v1979_v46 = vmul.f32 0.5, %v2879_v45  ;;  %v2810_v31 = vld [vmem:[%s3986_s6 + $0x8] sm:$0xff]  }
 0x74f   :  { %v1981_v35 = vmul.f32 %v1972_v33, %v3853_v37  ;;  %v1980_v47 = vadd.f32 0.5, %v1979_v46  ;;  %v2811_v33 = vld [vmem:[%s3986_s6] sm:$0xff]  }
 0x751   :  { %v3895_v44 = vadd.f32 %v1982_v34, %v1981_v35  ;;  %v2347_v34 = vld [vmem:[%s3989_s9] sm:$0x3f]  ;;  %v2589_v35 = vld [vmem:[#allocation11] ss:$0 sm:$0xff] }
 0x753   :  { %2880 = vtanh.f32 %v3895_v44 }
 0x760   :  { %v2881_v48 = vpop.eup %2880 }
 0x761   :  { %v1985_v49 = vmul.f32 %v2881_v48, %v1980_v47 }
 0x763   :  { %v1988_v50 = vpack.c.bf16 %v1985_v49, %v1985_v49 }
 0x765   :  { %2022 = vmatmul.mubr.bf16.vlgmr.msra.gmra.mxu0 %v1988_v50  ;;  %2063 = vmatmul.mubr.bf16.vlgmr.msra.gmra.mxu1 %v1988_v50  ;;  %v2346_v50 = vld [vmem:[#allocation14 + $0x78] sm:$0xff] }
 0x766   :  { %2648 = vmatpush3.bf16.msra.mxu0 %v2796_v51  ;;  %2663 = vmatprep.mubr.msk.bf16.mxu0 %vm3109_vm2, %v3108_v26 }
 0x767   :  { %2649 = vmatprep.subr.bf16.mxu0 %v3108_v26  ;;  %2683 = vmatprep.mubr.msk.bf16.mxu1 %vm3109_vm2, %v3108_v26 }
 0x768   :  { %2668 = vmatpush3.bf16.msra.mxu1 %v2804_v60  ;;  %v2338_v60 = vld [vmem:[#allocation14 + $0x38] sm:$0xff] }
 0x769   :  { %2669 = vmatprep.subr.bf16.mxu1 %v3108_v26 }
 0x76a   :  { %2650 = vmatpush3.bf16.msra.mxu0 %v2797_v52  ;;  %v2345_v52 = vld [vmem:[#allocation14 + $0x70] sm:$0xff] }
 0x76b   :  { %2651 = vmatprep.subr.bf16.mxu0 %v3108_v26 }
 0x76c   :  { %2670 = vmatpush3.bf16.msra.mxu1 %v2805_v7  ;;  %v2337_v7 = vld [vmem:[#allocation14 + $0x30] sm:$0xff] }
 0x76d   :  { %2671 = vmatprep.subr.bf16.mxu1 %v3108_v26 }
 0x76e   :  { %2652 = vmatpush3.bf16.msra.mxu0 %v2798_v27  ;;  %v2344_v27 = vld [vmem:[#allocation14 + $0x68] sm:$0xff] }
 0x76f   :  { %2653 = vmatprep.subr.bf16.mxu0 %v3108_v26 }
 0x770   :  { %2672 = vmatpush3.bf16.msra.mxu1 %v2806_v12  ;;  %v2336_v12 = vld [vmem:[#allocation14 + $0x28] sm:$0xff] }
 0x771   :  { %2673 = vmatprep.subr.bf16.mxu1 %v3108_v26 }
 0x772   :  { %2654 = vmatpush3.bf16.msra.mxu0 %v2799_v53  ;;  %v2343_v53 = vld [vmem:[#allocation14 + $0x60] sm:$0xff] }
 0x773   :  { %2655 = vmatprep.subr.bf16.mxu0 %v3108_v26 }
 0x774   :  { %2674 = vmatpush3.bf16.msra.mxu1 %v2807_v10  ;;  %v2335_v10 = vld [vmem:[#allocation14 + $0x20] sm:$0xff] }
 0x775   :  { %2675 = vmatprep.subr.bf16.mxu1 %v3108_v26 }
 0x776   :  { %2656 = vmatpush3.bf16.msra.mxu0 %v2800_v54  ;;  %v2342_v54 = vld [vmem:[#allocation14 + $0x58] sm:$0xff] }
 0x777   :  { %2657 = vmatprep.subr.bf16.mxu0 %v3108_v26 }
 0x778   :  { %2676 = vmatpush3.bf16.msra.mxu1 %v2808_v11  ;;  %v2334_v11 = vld [vmem:[#allocation14 + $0x18] sm:$0xff] }
 0x779   :  { %2677 = vmatprep.subr.bf16.mxu1 %v3108_v26 }
 0x77a   :  { %2658 = vmatpush3.bf16.msra.mxu0 %v2801_v55  ;;  %v2341_v55 = vld [vmem:[#allocation14 + $0x50] sm:$0xff] }
 0x77b   :  { %2659 = vmatprep.subr.bf16.mxu0 %v3108_v26 }
 0x77c   :  { %2678 = vmatpush3.bf16.msra.mxu1 %v2809_v62  ;;  %v2333_v62 = vld [vmem:[#allocation14 + $0x10] sm:$0xff] }
 0x77d   :  { %2679 = vmatprep.subr.bf16.mxu1 %v3108_v26 }
 0x77e   :  { %2660 = vmatpush3.bf16.msra.mxu0 %v2802_v56  ;;  %v2340_v56 = vld [vmem:[#allocation14 + $0x48] sm:$0xff] }
 0x77f   :  { %2661 = vmatprep.subr.bf16.mxu0 %v3108_v26 }
 0x780   :  { %2680 = vmatpush3.bf16.msra.mxu1 %v2810_v31 }
 0x781   :  { %2681 = vmatprep.subr.bf16.mxu1 %v3108_v26 }
 0x782   :  { %2662 = vmatpush3.bf16.msra.mxu0 %v2803_v19  ;;  %v2339_v19 = vld [vmem:[#allocation14 + $0x40] sm:$0xff] }
 0x783   :  { %2687 = vmatprep.subr.mxu0 %v3108_v26 }
 0x784   :  { %2682 = vmatpush3.bf16.msra.mxu1 %v2811_v33 }
 0x785   :  { %2692 = vmatprep.subr.mxu1 %v3108_v26 }
 0x825   :  { %v2023_v8 = vpop.f32.mrf.mxu0  ;;  %v2064_v36 = vpop.f32.mrf.mxu1 }
 0x827   :  { %v2025_v37 = vpop.f32.mrf.mxu0  ;;  %v2066_v38 = vpop.f32.mrf.mxu1 }
 0x828   :  { %v2075_v39 = vcombine.low %v2023_v8, %v2025_v37  ;;  %v2076_v57 = vcombine.low %v2064_v36, %v2066_v38  ;;  %v2332_v8 = vld [vmem:[#allocation14 + $0x8] sm:$0xff]  ;;  %v2607_v36 = vld [vmem:[%s3980_s0 + $0x1c] sm:$0xf]  ;;  %v2598_v38 = vld [vmem:[#allocation12] ss:$0 sm:$0xff]  ;;  %s3064_s0 = scalar_lea.vmem %s2503_s15, 64 }
 0x829   :  { %v2027_v40 = vpop.f32.mrf.mxu0  ;;  %v2068_v41 = vpop.f32.mrf.mxu1  ;;  %v2331_v37 = vld [vmem:[#allocation14] sm:$0xff]  ;;  %p3065_p7 = scmp.ne.s32.totalorder %s2503_s15, %s3064_s0  ;;  %p3070_p9 = scmp.lt.s32.totalorder %s3064_s0, %s3064_s0 }
 0x82a   :  { %v2079_v0 = vadd.f32 %v2075_v39, %v4057_v43  ;;  %v2080_v58 = vadd.f32 %v2076_v57, %v4060_v21 }
 0x82b   :  { %v2028_v32 = vpop.f32.mrf.mxu0  ;;  %v2069_v20 = vpop.f32.mrf.mxu1  ;;  %p3071_p10 = por %p3070_p9, %p3069_p8 }
 0x82c   :  { %v2081_v23 = vmul.f32 0.5, %v2079_v0  ;;  %v2086_v22 = vrot.slane %v2079_v0, 4  ;;  %v2094_v17 = vrot.slane %v2080_v58, 4 }
 0x82d   :  { %p3072_p11 = pnand %p3071_p10, %p3065_p7 }
 0x82e   :  { %2882 = vtanh.f32 %v2081_v23  ;;  %v2088_v5 = vmul.f32 0.5, %v2086_v22  ;;  %v2096_v63 = vmul.f32 0.5, %v2094_v17 }
 0x830   :  { %2884 = vtanh.f32 %v2088_v5 }
 0x831   :  { %2886 = vtanh.f32 %v2080_v58 }
 0x832   :  { %2888 = vtanh.f32 %v2096_v63 }
 0x83b   :  { %v2883_v3 = vpop.eup %2882 }
 0x83c   :  { %v2083_v2 = vmul.f32 0.5, %v2883_v3 }
 0x83d   :  { %v2885_v61 = vpop.eup %2884 }
 0x83e   :  { %v2084_v59 = vadd.f32 0.5, %v2083_v2  ;;  %v2090_v14 = vmul.f32 0.5, %v2885_v61  ;;  %v2887_v24 = vpop.eup %2886 }
 0x83f   :  { %v2889_v6 = vpop.eup %2888 }
 0x840   :  { %v2091_v13 = vadd.f32 0.5, %v2090_v14  ;;  %v2101_v9 = vmul.f32 %v2887_v24, %v2084_v59  ;;  %v2098_v16 = vmul.f32 0.5, %v2889_v6 }
 0x842   :  { %v2100_v18 = vmul.f32 %v2091_v13, %v3895_v44  ;;  %v2099_v15 = vadd.f32 0.5, %v2098_v16 }
 0x844   :  { %v2102_v4 = vadd.f32 %v2101_v9, %v2100_v18 }
 0x846   :  { %2890 = vtanh.f32 %v2102_v4 }
 0x853   :  { %v2891_v28 = vpop.eup %2890 }
 0x854   :  { %v2104_v29 = vmul.f32 %v2891_v28, %v2099_v15 }
 0x856   :  { %v2137_v30 = vpack.c.bf16 %v2104_v29, %v2104_v29 }
 0x858   :  { %2664 = vmatmul.mubr.bf16.vlgmr.msra.gmra.mxu0 %v2137_v30 }
 0x859   :  { %2689 = vmatprep.mubr.msk.f32.mxu0 %vm3109_vm2, %v3108_v26  ;;  %2688 = vmatpush3.msk.msra.mxu0 %vm2351_vm3, %v2347_v34 }
 0x860   :  { %2690 = vmatmul.mubr.msk.f32.vlgmr.msra.gmra.mxu0 %vm192_vm1, %v2607_v36 }
 0x918   :  { %v2227_v44 = vpop.f32.mrf.mxu0 }
 0x919   :  { %v2228_v45 = vadd.f32 %v2589_v35, %v2227_v44 }
 0x91a   :  { %v2665_v46 = vpop.f32.mrf.mxu0 }
 0x91b   :  { %v2233_v47 = vmax.f32 %v2228_v45, 0.0 }
 0x91c   :  { %v2230_v48 = vpop.f32.mrf.mxu0 }
 0x91d   :  { %v2234_v49 = vpack.c.bf16 %v2233_v47, %v2233_v47 }
 0x91e   :  { %v2666_v51 = vpop.f32.mrf.mxu0 }
 0x91f   :  { %2684 = vmatmul.mubr.bf16.vlgmr.msra.gmra.mxu1 %v2234_v49 }
 0x920   :  { %2693 = vmatpush3.msra.mxu1 %v2346_v50  ;;  %2724 = vmatprep.mubr.msk.f32.mxu1 %vm3109_vm2, %v3108_v26  ;;  %v2421_v0 = vpop.f32.mrf.mxu0 }
 0x921   :  { %2694 = vmatprep.subr.mxu1 %v3108_v26 }
 0x922   :  { %2695 = vmatpush3.msra.mxu1 %v2345_v52  ;;  %v2691_v57 = vpop.f32.mrf.mxu0 }
 0x923   :  { %2696 = vmatprep.subr.mxu1 %v3108_v26 }
 0x924   :  { %2697 = vmatpush3.msra.mxu1 %v2344_v27 }
 0x925   :  { %2698 = vmatprep.subr.mxu1 %v3108_v26 }
 0x926   :  { %2699 = vmatpush3.msra.mxu1 %v2343_v53 }
 0x927   :  { %2700 = vmatprep.subr.mxu1 %v3108_v26 }
 0x928   :  { %2701 = vmatpush3.msra.mxu1 %v2342_v54 }
 0x929   :  { %2702 = vmatprep.subr.mxu1 %v3108_v26 }
 0x92a   :  { %2703 = vmatpush3.msra.mxu1 %v2341_v55 }
 0x92b   :  { %2704 = vmatprep.subr.mxu1 %v3108_v26 }
 0x92c   :  { %2705 = vmatpush3.msra.mxu1 %v2340_v56 }
 0x92d   :  { %2706 = vmatprep.subr.mxu1 %v3108_v26 }
 0x92e   :  { %2707 = vmatpush3.msra.mxu1 %v2339_v19 }
 0x92f   :  { %2708 = vmatprep.subr.mxu1 %v3108_v26 }
 0x930   :  { %2709 = vmatpush3.msra.mxu1 %v2338_v60 }
 0x931   :  { %2710 = vmatprep.subr.mxu1 %v3108_v26 }
 0x932   :  { %2711 = vmatpush3.msra.mxu1 %v2337_v7 }
 0x933   :  { %2712 = vmatprep.subr.mxu1 %v3108_v26 }
 0x934   :  { %2713 = vmatpush3.msra.mxu1 %v2336_v12 }
 0x935   :  { %2714 = vmatprep.subr.mxu1 %v3108_v26 }
 0x936   :  { %2715 = vmatpush3.msra.mxu1 %v2335_v10 }
 0x937   :  { %2716 = vmatprep.subr.mxu1 %v3108_v26 }
 0x938   :  { %2717 = vmatpush3.msra.mxu1 %v2334_v11 }
 0x939   :  { %2718 = vmatprep.subr.mxu1 %v3108_v26 }
 0x93a   :  { %2719 = vmatpush3.msra.mxu1 %v2333_v62 }
 0x93b   :  { %2720 = vmatprep.subr.mxu1 %v3108_v26 }
 0x93c   :  { %2721 = vmatpush3.msra.mxu1 %v2332_v8 }
 0x93d   :  { %2722 = vmatprep.subr.mxu1 %v3108_v26 }
 0x93e   :  { %2723 = vmatpush3.msra.mxu1 %v2331_v37 }
 0x9df   :  { %v2324_v39 = vpop.f32.mrf.mxu1 }
 0x9e0   :  { %v2325_v40 = vadd.f32 %v2598_v38, %v2324_v39 }
 0x9e1   :  { %v2685_v41 = vpop.f32.mrf.mxu1 }
 0x9e2   :  { %2725 = vmatmul.mubr.f32.vlgmr.msra.gmra.mxu1 %v2325_v40 }
 0x9e3   :  { %v2327_v42 = vpop.f32.mrf.mxu1 }
 0x9e5   :  { %v2686_v43 = vpop.f32.mrf.mxu1 }
 0xaa2   :  { %v2491_v32 = vpop.f32.mrf.mxu1 }
 0xaa3   :  { %v2492_v20 = vadd.f32 %v2491_v32, %v2421_v0 }
 0xaa4   :  { %v2726_v23 = vpop.f32.mrf.mxu1 }
 0xaa5   :  { %2495 = vst [vmem:[#allocation15] sm:$0xf] %v2492_v20 }
 0xaa6   :  { %3075 = shalt.err (!%p3072_p11)
}
 0xaa7   :  { %2505 = dma.vmem_to_hbm [thread:$0]  %s2503_s15, 64, %s3990_s10, [#allocation5]  }
 0xaa8   :  { %3092 = dma.done.wait [#allocation5], 64  }
 0xaa9   :  { %3093 = vsyncadd [#allocation5], 4294967232 }
 0xaaa   :  { %2509 = vsyncpa [#allocation4], 1 }
 0xaab   :  { %2510 = vsyncpa [#allocation7], 1 }
 0xaac   :  { %2511 = vsyncpa [#allocation10], 1 }
 0xaad   :  { %2512 = vsyncpa [#allocation13], 1 }
 0xaae   :  { %2513 = vsyncpa [#allocation5], 1 }

</bundles_post_ra>
